<compile_context>
chip_gen: v7x
topology: tpu7x:2x2x1
jax: 0.10.0
libtpu: 0.0.40
codegen_flags: <defaults>
</compile_context>

<pallas_src>
import functools
import numpy as np
import jax
import jax.numpy as jnp
from jax import lax
from jax.experimental import pallas as pl
from jax.experimental.pallas import tpu as pltpu


# ----------------------------------------------------------------------------- #
# helpers
# ----------------------------------------------------------------------------- #
_VMEM_LIMIT = 32 * 1024 * 1024   # raise v5e's 16 MiB scoped default; default on v6e/v7x

_PAR1 = pltpu.CompilerParams(dimension_semantics=("parallel",),
                             vmem_limit_bytes=_VMEM_LIMIT)


def _row_tile(M):
    # Prefer a multiple-of-8 tile that divides M with >= 2 grid steps; otherwise fall back
    # to 8-row tiles and pad the rows (never a single monolithic grid step unless M <= 8).
    for t in (256, 128, 64, 32, 16, 8):
        if M % t == 0 and M // t >= 2:
            return t
    return 8


def _pad_rows(x2d, Mp):
    M = x2d.shape[0]
    if Mp == M:
        return x2d
    return jnp.pad(x2d, ((0, Mp - M), (0, 0)))


# ----------------------------------------------------------------------------- #
# Pallas kernels
# ----------------------------------------------------------------------------- #
def _layernorm(x, g, b, eps):
    # torch-style Norm: unbiased std, eps added to std. Exact reciprocal (accuracy).
    d = x.shape[-1]
    mean = jnp.mean(x, axis=-1, keepdims=True)
    var = jnp.sum((x - mean) ** 2, axis=-1, keepdims=True) * (1.0 / (d - 1))
    return g * (x - mean) / (jnp.sqrt(var) + eps) + b


def _ln_linear_kernel(x_ref, g_ref, bln_ref, w_ref, b_ref, o_ref, *, eps, relu):
    xn = _layernorm(x_ref[...].astype(jnp.float32), g_ref[...], bln_ref[...], eps)
    y = jnp.dot(xn.astype(jnp.bfloat16), w_ref[...],
                preferred_element_type=jnp.float32) + b_ref[...]
    if relu:
        y = jnp.maximum(y, 0.0)
    o_ref[...] = y.astype(o_ref.dtype)


def _linear_kernel(x_ref, w_ref, b_ref, o_ref, *, relu):
    y = jnp.dot(x_ref[...].astype(jnp.bfloat16), w_ref[...],
                preferred_element_type=jnp.float32) + b_ref[...]
    if relu:
        y = jnp.maximum(y, 0.0)
    o_ref[...] = y.astype(o_ref.dtype)


def _ffn_kernel(x_ref, g_ref, bln_ref, w1_ref, b1_ref, w2_ref, b2_ref, o_ref, *, eps):
    # Fused position-wise FFN: LN + W1 + ReLU + W2 + bias + residual; hidden never hits HBM.
    x = x_ref[...].astype(jnp.float32)
    xn = _layernorm(x, g_ref[...], bln_ref[...], eps)
    h = jnp.dot(xn.astype(jnp.bfloat16), w1_ref[...],
                preferred_element_type=jnp.float32) + b1_ref[...]
    h = jnp.maximum(h, 0.0)
    y = jnp.dot(h.astype(jnp.bfloat16), w2_ref[...],
                preferred_element_type=jnp.float32) + b2_ref[...]
    o_ref[...] = (y + x).astype(o_ref.dtype)


def _layernorm_kernel(x_ref, g_ref, b_ref, o_ref, *, eps):
    o_ref[...] = _layernorm(x_ref[...].astype(jnp.float32),
                            g_ref[...], b_ref[...], eps).astype(o_ref.dtype)


def _mha_into_scratch(q, kv, bias, attn_sc, heads, dk, scale):
    # q: (Lq, H*dk) bf16, kv: (Lk, 2*H*dk) bf16, bias: f32 additive (broadcastable to Lq,Lk).
    # Per-head attention written directly into lane slices of a VMEM scratch slab.
    # TODO(synk): dk-deep QK^T contraction underfills the MXU on v6e/v7x; batch heads /
    #             dk>=128 layouts would be the production fix.
    D = heads * dk
    for h in range(heads):                           # static unroll; no HBM transpose
        qh = q[:, h * dk:(h + 1) * dk]
        kh = kv[:, h * dk:(h + 1) * dk]
        vh = kv[:, D + h * dk:D + (h + 1) * dk]
        s = lax.dot_general(qh, kh, (((1,), (1,)), ((), ())),
                            preferred_element_type=jnp.float32) * scale + bias
        m = jnp.max(s, axis=-1, keepdims=True)
        e = jnp.exp(s - m)
        p = e * pl.reciprocal(jnp.sum(e, axis=-1, keepdims=True), approx=True)
        attn_sc[:, h * dk:(h + 1) * dk] = jnp.dot(
            p.astype(jnp.bfloat16), vh, preferred_element_type=jnp.float32)


def _proj_residual(attn_sc, wo_ref, bo_ref, res_ref, o_ref):
    # Fused output projection + bias + residual add (single D-deep matmul on the MXU).
    out = jnp.dot(attn_sc[...].astype(jnp.bfloat16), wo_ref[...],
                  preferred_element_type=jnp.float32) + bo_ref[...]
    o_ref[0] = (out + res_ref[0].astype(jnp.float32)).astype(o_ref.dtype)


def _attn_self_kernel(thr_ref, q_ref, kv_ref, wo_ref, bo_ref, res_ref, o_ref, attn_sc,
                      *, heads, dk, scale):
    # One batch element per grid step. Causal + combined-padding bias built in-kernel from
    # the per-batch threshold (scalar prefetch, SMEM) — no dense (B,Lq,Lk) HBM mask.
    b = pl.program_id(0)
    thr = thr_ref[b]
    q = q_ref[0].astype(jnp.bfloat16)
    kv = kv_ref[0].astype(jnp.bfloat16)
    Lq, Lk = q.shape[0], kv.shape[0]
    row = lax.broadcasted_iota(jnp.int32, (Lq, Lk), 0)
    col = lax.broadcasted_iota(jnp.int32, (Lq, Lk), 1)
    keep = (col <= row) & (row < thr)
    bias = jnp.where(keep, 0.0, -1e9).astype(jnp.float32)
    _mha_into_scratch(q, kv, bias, attn_sc, heads, dk, scale)
    _proj_residual(attn_sc, wo_ref, bo_ref, res_ref, o_ref)


def _attn_cross_kernel(q_ref, kv_ref, bias_ref, wo_ref, bo_ref, res_ref, o_ref, attn_sc,
                       *, heads, dk, scale):
    # Key-padding bias arrives as (1, 1, Lk) and is broadcast over query rows in-kernel.
    q = q_ref[0].astype(jnp.bfloat16)
    kv = kv_ref[0].astype(jnp.bfloat16)
    bias = bias_ref[0].astype(jnp.float32)          # (1, Lk) -> broadcast over Lq
    _mha_into_scratch(q, kv, bias, attn_sc, heads, dk, scale)
    _proj_residual(attn_sc, wo_ref, bo_ref, res_ref, o_ref)


# ----------------------------------------------------------------------------- #
# kernel wrappers
# ----------------------------------------------------------------------------- #
def ln_linear(x, gamma, beta, w, b, relu=False, eps=1e-6, out_dtype=None):
    orig = x.shape
    M = int(np.prod(orig[:-1]))
    K = orig[-1]
    N = w.shape[1]
    tm = _row_tile(M)
    Mp = tm * pl.cdiv(M, tm)
    out_dtype = x.dtype if out_dtype is None else out_dtype
    out = pl.pallas_call(
        functools.partial(_ln_linear_kernel, eps=eps, relu=relu),
        out_shape=jax.ShapeDtypeStruct((Mp, N), out_dtype),
        grid=(Mp // tm,),
        in_specs=[
            pl.BlockSpec((tm, K), lambda i: (i, 0)),
            pl.BlockSpec((1, K), lambda i: (0, 0)),
            pl.BlockSpec((1, K), lambda i: (0, 0)),
            pl.BlockSpec((K, N), lambda i: (0, 0)),
            pl.BlockSpec((1, N), lambda i: (0, 0)),
        ],
        out_specs=pl.BlockSpec((tm, N), lambda i: (i, 0)),
        compiler_params=_PAR1,
    )(_pad_rows(x.reshape(M, K), Mp), gamma.reshape(1, K), beta.reshape(1, K),
      w, b.reshape(1, N))
    return out[:M].reshape(*orig[:-1], N)


def linear(x, w, b, relu=False, out_dtype=None):
    orig = x.shape
    M = int(np.prod(orig[:-1]))
    K = orig[-1]
    N = w.shape[1]
    tm = _row_tile(M)
    Mp = tm * pl.cdiv(M, tm)
    out_dtype = x.dtype if out_dtype is None else out_dtype
    out = pl.pallas_call(
        functools.partial(_linear_kernel, relu=relu),
        out_shape=jax.ShapeDtypeStruct((Mp, N), out_dtype),
        grid=(Mp // tm,),
        in_specs=[
            pl.BlockSpec((tm, K), lambda i: (i, 0)),
            pl.BlockSpec((K, N), lambda i: (0, 0)),
            pl.BlockSpec((1, N), lambda i: (0, 0)),
        ],
        out_specs=pl.BlockSpec((tm, N), lambda i: (i, 0)),
        compiler_params=_PAR1,
    )(_pad_rows(x.reshape(M, K), Mp), w, b.reshape(1, N))
    return out[:M].reshape(*orig[:-1], N)


def ffn_fused(x, gamma, beta, w1, b1, w2, b2, eps=1e-6):
    orig = x.shape
    M = int(np.prod(orig[:-1]))
    K = orig[-1]
    F = w1.shape[1]
    N = w2.shape[1]
    tm = _row_tile(M)
    Mp = tm * pl.cdiv(M, tm)
    out = pl.pallas_call(
        functools.partial(_ffn_kernel, eps=eps),
        out_shape=jax.ShapeDtypeStruct((Mp, N), x.dtype),
        grid=(Mp // tm,),
        in_specs=[
            pl.BlockSpec((tm, K), lambda i: (i, 0)),
            pl.BlockSpec((1, K), lambda i: (0, 0)),
            pl.BlockSpec((1, K), lambda i: (0, 0)),
            pl.BlockSpec((K, F), lambda i: (0, 0)),
            pl.BlockSpec((1, F), lambda i: (0, 0)),
            pl.BlockSpec((F, N), lambda i: (0, 0)),
            pl.BlockSpec((1, N), lambda i: (0, 0)),
        ],
        out_specs=pl.BlockSpec((tm, N), lambda i: (i, 0)),
        compiler_params=_PAR1,
    )(_pad_rows(x.reshape(M, K), Mp), gamma.reshape(1, K), beta.reshape(1, K),
      w1, b1.reshape(1, F), w2, b2.reshape(1, N))
    return out[:M].reshape(*orig[:-1], N)


def layer_norm(x, gamma, beta, eps=1e-6):
    orig = x.shape
    M = int(np.prod(orig[:-1]))
    D = orig[-1]
    tm = _row_tile(M)
    Mp = tm * pl.cdiv(M, tm)
    out = pl.pallas_call(
        functools.partial(_layernorm_kernel, eps=eps),
        out_shape=jax.ShapeDtypeStruct((Mp, D), x.dtype),
        grid=(Mp // tm,),
        in_specs=[
            pl.BlockSpec((tm, D), lambda i: (i, 0)),
            pl.BlockSpec((1, D), lambda i: (0, 0)),
            pl.BlockSpec((1, D), lambda i: (0, 0)),
        ],
        out_specs=pl.BlockSpec((tm, D), lambda i: (i, 0)),
        compiler_params=_PAR1,
    )(_pad_rows(x.reshape(M, D), Mp), gamma.reshape(1, D), beta.reshape(1, D))
    return out[:M].reshape(orig)


def attn_self_fused(q, kv, thr, wo, bo, residual, heads):
    # q: (B, Lq, D) bf16, kv: (B, Lk, 2D) bf16 fused [K|V], thr: (B,) int32 scalar prefetch,
    # residual: (B, Lq, D) f32.  Output = softmax(QK^T*s + causal/pad bias) V Wo + bo + res.
    B, Lq, D = q.shape
    Lk = kv.shape[1]
    dk = D // heads
    scale = 1.0 / float(np.sqrt(dk))
    return pl.pallas_call(
        functools.partial(_attn_self_kernel, heads=heads, dk=dk, scale=scale),
        out_shape=jax.ShapeDtypeStruct((B, Lq, D), residual.dtype),
        grid_spec=pltpu.PrefetchScalarGridSpec(
            num_scalar_prefetch=1,
            grid=(B,),
            in_specs=[
                pl.BlockSpec((1, Lq, D), lambda b, thr: (b, 0, 0)),
                pl.BlockSpec((1, Lk, 2 * D), lambda b, thr: (b, 0, 0)),
                pl.BlockSpec((D, D), lambda b, thr: (0, 0)),
                pl.BlockSpec((1, D), lambda b, thr: (0, 0)),
                pl.BlockSpec((1, Lq, D), lambda b, thr: (b, 0, 0)),
            ],
            out_specs=pl.BlockSpec((1, Lq, D), lambda b, thr: (b, 0, 0)),
            scratch_shapes=[pltpu.VMEM((Lq, D), jnp.float32)]),
        compiler_params=_PAR1,
    )(thr, q, kv, wo, bo.reshape(1, D), residual)


def attn_cross_fused(q, kv, bias_k, wo, bo, residual, heads):
    # bias_k: (B, 1, Lk) additive key-padding bias (0 / -1e9), broadcast in-kernel over Lq.
    B, Lq, D = q.shape
    Lk = kv.shape[1]
    dk = D // heads
    scale = 1.0 / float(np.sqrt(dk))
    return pl.pallas_call(
        functools.partial(_attn_cross_kernel, heads=heads, dk=dk, scale=scale),
        out_shape=jax.ShapeDtypeStruct((B, Lq, D), residual.dtype),
        grid=(B,),
        in_specs=[
            pl.BlockSpec((1, Lq, D), lambda b: (b, 0, 0)),
            pl.BlockSpec((1, Lk, 2 * D), lambda b: (b, 0, 0)),
            pl.BlockSpec((1, 1, Lk), lambda b: (b, 0, 0)),
            pl.BlockSpec((D, D), lambda b: (0, 0)),
            pl.BlockSpec((1, D), lambda b: (0, 0)),
            pl.BlockSpec((1, Lq, D), lambda b: (b, 0, 0)),
        ],
        out_specs=pl.BlockSpec((1, Lq, D), lambda b: (b, 0, 0)),
        scratch_shapes=[pltpu.VMEM((Lq, D), jnp.float32)],
        compiler_params=_PAR1,
    )(q, kv, bias_k, wo, bo.reshape(1, D), residual)


# ----------------------------------------------------------------------------- #
# Model pieces built on the kernels
# ----------------------------------------------------------------------------- #
def _combined_mask_threshold(trg):
    # Device-side (jittable) equivalent of ConvAlternatingDecoder2.create_combined_mask:
    # combined_mask[b, i, k] = (k <= i) and (i < thr[b]); thr[b] = min over j <= min(b, B-2)
    # of the first padding index of row j (rows with no/leading padding impose no limit).
    B, L = trg.shape
    first_zero = jnp.argmax(trg == 0, axis=1).astype(jnp.int32)       # 0 if none / at pos 0
    sentinel = jnp.int32(L)                                           # "no restriction"
    ps = jnp.where(first_zero > 0, first_zero, sentinel)
    ps = jnp.where(jnp.arange(B) < B - 1, ps, sentinel)               # last batch row excluded
    return lax.cummin(ps)                                             # (B,) int32


def alternating_decoder_layer(x, y, e_outputs, src_bias_k, trg_thr, p, heads):
    # --- masked stream attention: q from norm(x), k/v from norm(y); Wo+residual fused ---
    q = ln_linear(x, p["n1_g"], p["n1_b"], p["attn1"]["wq"], p["attn1"]["bq"],
                  out_dtype=jnp.bfloat16)
    kv = ln_linear(y, p["ny_g"], p["ny_b"], p["attn1"]["wkv"], p["attn1"]["bkv"],
                   out_dtype=jnp.bfloat16)
    x = attn_self_fused(q, kv, trg_thr, p["attn1"]["wo"], p["attn1"]["bo"], x, heads)
    # --- encoder cross attention: q from norm(x), k/v from e_outputs; Wo+residual fused ---
    q = ln_linear(x, p["n2_g"], p["n2_b"], p["attn2"]["wq"], p["attn2"]["bq"],
                  out_dtype=jnp.bfloat16)
    kv = linear(e_outputs, p["attn2"]["wkv"], p["attn2"]["bkv"], out_dtype=jnp.bfloat16)
    x = attn_cross_fused(q, kv, src_bias_k, p["attn2"]["wo"], p["attn2"]["bo"], x, heads)
    # --- fully fused position-wise FFN (LN + W1 + ReLU + W2 + bias + residual) ---
    x = ffn_fused(x, p["n3_g"], p["n3_b"], p["ff_w1"], p["ff_b1"], p["ff_w2"], p["ff_b2"])
    return x, y


def alternating_decoder_forward(params, trg, e_outputs, src_mask, heads, n_layers):
    B, L = trg.shape
    D = params["embedding"].shape[1]
    trg_thr = _combined_mask_threshold(trg)                            # (B,) int32, on device
    src_bias_k = (jnp.float32(-1e9)
                  * (1.0 - src_mask[:, 0, 0, :].astype(jnp.float32)))[:, None, :]   # (B,1,Lk)
    y = jnp.broadcast_to(params["y"][None], (B,) + params["y"].shape)  # y.expand(B,-1,-1)
    x = jnp.take(params["embedding"], trg.astype(jnp.int32), axis=0)   # glue: gather
    # ScaledPositionalEncoding: x*sqrt(d_model) + alpha*pe — trivial elementwise, XLA fuses it.
    x = x * jnp.float32(np.sqrt(D)) + params["pe_alpha"] * params["pe_table"][:L][None]
    for i in range(n_layers):
        x, y = alternating_decoder_layer(x, y, e_outputs, src_bias_k, trg_thr,
                                         params["layers"][i], heads)
    return layer_norm(x, params["norm_g"], params["norm_b"])


# ----------------------------------------------------------------------------- #
# Deterministic parameter init (synthetic; mirrors module __init__ shapes).
# Matmul weights stored bf16 (MXU operands); biases / LN params stay f32.
# ----------------------------------------------------------------------------- #
def _mha_params(key, d_model):
    ks = jax.random.split(key, 4)
    s = 1.0 / np.sqrt(d_model)
    wq = jax.random.normal(ks[0], (d_model, d_model), jnp.float32) * s
    wk = jax.random.normal(ks[1], (d_model, d_model), jnp.float32) * s
    wv = jax.random.normal(ks[2], (d_model, d_model), jnp.float32) * s
    wo = jax.random.normal(ks[3], (d_model, d_model), jnp.float32) * s
    return {
        "wq": wq.astype(jnp.bfloat16),
        "wkv": jnp.concatenate([wk, wv], axis=1).astype(jnp.bfloat16),   # fused K|V
        "wo": wo.astype(jnp.bfloat16),
        "bq": jnp.zeros((d_model,), jnp.float32),
        "bkv": jnp.zeros((2 * d_model,), jnp.float32),
        "bo": jnp.zeros((d_model,), jnp.float32),
    }


def _layer_params(key, d_model, d_ff):
    ks = jax.random.split(key, 4)
    s1, s2 = 1.0 / np.sqrt(d_model), 1.0 / np.sqrt(d_ff)
    ones = jnp.ones((d_model,), jnp.float32)
    zeros = jnp.zeros((d_model,), jnp.float32)
    return {
        "attn1": _mha_params(ks[0], d_model),
        "attn2": _mha_params(ks[1], d_model),
        "ff_w1": (jax.random.normal(ks[2], (d_model, d_ff), jnp.float32) * s1).astype(jnp.bfloat16),
        "ff_b1": jnp.zeros((d_ff,), jnp.float32),
        "ff_w2": (jax.random.normal(ks[3], (d_ff, d_model), jnp.float32) * s2).astype(jnp.bfloat16),
        "ff_b2": zeros,
        "n1_g": ones, "n1_b": zeros,
        "n2_g": ones, "n2_b": zeros,
        "n3_g": ones, "n3_b": zeros,
        "ny_g": ones, "ny_b": zeros,
    }


def _sinusoid_pe(max_seq, d_model):
    pe = np.zeros((max_seq, d_model), np.float32)
    pos = np.arange(max_seq, dtype=np.float32)[:, None]
    div = np.exp(np.arange(0, d_model, 2, dtype=np.float32) * -(np.log(10000.0) / d_model))
    pe[:, 0::2] = np.sin(pos * div)
    pe[:, 1::2] = np.cos(pos * div)
    return jnp.asarray(pe)


def init_params(key, vocab, max_seq, d_model, d_ff, n_layers, heads):
    ks = jax.random.split(key, 2 + n_layers)
    emb = jax.random.normal(ks[0], (vocab, d_model), jnp.float32)
    emb = emb.at[0].set(0.0)                                   # padding_idx=0
    return {
        "embedding": emb,
        "pe_table": _sinusoid_pe(max_seq, d_model),
        "pe_alpha": jnp.ones((1,), jnp.float32),
        "y": jax.random.normal(ks[1], (max_seq, d_model), jnp.float32),
        "layers": [_layer_params(ks[2 + i], d_model, d_ff) for i in range(n_layers)],
        "norm_g": jnp.ones((d_model,), jnp.float32),
        "norm_b": jnp.zeros((d_model,), jnp.float32),
    }


# ----------------------------------------------------------------------------- #
if __name__ == "__main__":
    VOCAB, MAX_SEQ, D_MODEL, D_FF, N_LAYERS, HEADS = 11, 8, 32, 64, 2, 4
    B, L, S_ENC = 2, MAX_SEQ, 8

    root = jax.random.PRNGKey(0)
    k_params, k_trg, k_enc = jax.random.split(root, 3)

    params = init_params(k_params, VOCAB, MAX_SEQ, D_MODEL, D_FF, N_LAYERS, HEADS)

    trg = jax.random.randint(k_trg, (B, L), 1, VOCAB, dtype=jnp.int32)
    trg = trg.at[0, 6:].set(0)                 # padding in batch 0 exercises combined mask
    e_outputs = jax.random.normal(k_enc, (B, S_ENC, D_MODEL), jnp.float32)

    src_mask_np = np.ones((B, 1, 1, S_ENC), np.float32)
    src_mask_np[1, :, :, 6:] = 0.0
    src_mask = jnp.asarray(src_mask_np)

    fwd = jax.jit(functools.partial(alternating_decoder_forward,
                                    heads=HEADS, n_layers=N_LAYERS))
    out = fwd(params, trg, e_outputs, src_mask)
    out = jax.block_until_ready(out)
    assert out.shape == (B, L, D_MODEL) and out.dtype == jnp.float32
    assert bool(jnp.all(jnp.isfinite(out)))
    print("KERNEL_OK")
</pallas_src>

<mosaic_0001>
module attributes {stable_mosaic.version = 11 : i64} {
  func.func @_linear_kernel(%arg0: i32, %arg1: memref<8x32xf32, #tpu.memory_space<vmem>>, %arg2: memref<32x64xbf16, #tpu.memory_space<vmem>>, %arg3: memref<1x64xf32, #tpu.memory_space<vmem>>, %arg4: memref<8x64xbf16, #tpu.memory_space<vmem>>) attributes {dimension_semantics = [#tpu.dimension_semantics<parallel>], iteration_bounds = array<i64: 2>, scalar_prefetch = 0 : i64, scratch_operands = 0 : i64, tpu.core_type = #tpu.core_type<tc>, window_params = [{transform_indices = @transform_0, window_bounds = array<i64: 8, 32>}, {pipeline_mode = #tpu.pipeline_mode<synchronous>, transform_indices = @transform_1, window_bounds = array<i64: 32, 64>}, {pipeline_mode = #tpu.pipeline_mode<synchronous>, transform_indices = @transform_2, window_bounds = array<i64: 1, 64>}, {transform_indices = @transform_3, window_bounds = array<i64: 8, 64>}]} {
    %c0 = arith.constant 0 : index
    %c0_0 = arith.constant 0 : index
    %0 = vector.load %arg1[%c0, %c0_0] : memref<8x32xf32, #tpu.memory_space<vmem>>, vector<8x32xf32>
    %1 = arith.truncf %0 : vector<8x32xf32> to vector<8x32xbf16>
    %c0_1 = arith.constant 0 : index
    %c0_2 = arith.constant 0 : index
    %2 = vector.load %arg2[%c0_1, %c0_2] : memref<32x64xbf16, #tpu.memory_space<vmem>>, vector<32x64xbf16>
    %cst = arith.constant dense<0.000000e+00> : vector<8x64xf32>
    %3 = tpu.matmul %1, %2, %cst {dimension_numbers = #tpu.dot_dimension_numbers<[1], [0], [0], [1], [0, 0, 1, 1], [], []>} : vector<8x32xbf16>, vector<32x64xbf16>, vector<8x64xf32> -> vector<8x64xf32>
    %c0_3 = arith.constant 0 : index
    %c0_4 = arith.constant 0 : index
    %4 = vector.load %arg3[%c0_3, %c0_4] : memref<1x64xf32, #tpu.memory_space<vmem>>, vector<1x64xf32>
    %5 = vector.broadcast %4 : vector<1x64xf32> to vector<8x64xf32>
    %6 = arith.addf %3, %5 : vector<8x64xf32>
    %7 = arith.truncf %6 : vector<8x64xf32> to vector<8x64xbf16>
    %c0_5 = arith.constant 0 : index
    %c0_6 = arith.constant 0 : index
    %8 = vector.load %arg4[%c0_5, %c0_6] : memref<8x64xbf16, #tpu.memory_space<vmem>>, vector<8x64xbf16>
    tpu.vector_store %arg4[%c0_5, %c0_6], %7 {strides = array<i32>} : memref<8x64xbf16, #tpu.memory_space<vmem>>, vector<8x64xbf16>,
    return
  }
  func.func @transform_0(%arg0: i32) -> (i32, i32) {
    %c0_i32 = arith.constant 0 : i32
    %c0_i32_0 = arith.constant 0 : i32
    return %arg0, %c0_i32 : i32, i32
  }
  func.func @transform_1(%arg0: i32) -> (i32, i32) {
    %c0_i32 = arith.constant 0 : i32
    %c0_i32_0 = arith.constant 0 : i32
    %c0_i32_1 = arith.constant 0 : i32
    return %c0_i32, %c0_i32_0 : i32, i32
  }
  func.func @transform_2(%arg0: i32) -> (i32, i32) {
    %c0_i32 = arith.constant 0 : i32
    %c0_i32_0 = arith.constant 0 : i32
    %c0_i32_1 = arith.constant 0 : i32
    return %c0_i32, %c0_i32_0 : i32, i32
  }
  func.func @transform_3(%arg0: i32) -> (i32, i32) {
    %c0_i32 = arith.constant 0 : i32
    %c0_i32_0 = arith.constant 0 : i32
    return %arg0, %c0_i32 : i32, i32
  }
}

module attributes {stable_mosaic.version = 11 : i64} {
  func.func @_ln_linear_kernel(%arg0: i32, %arg1: memref<8x32xf32, #tpu.memory_space<vmem>>, %arg2: memref<1x32xf32, #tpu.memory_space<vmem>>, %arg3: memref<1x32xf32, #tpu.memory_space<vmem>>, %arg4: memref<32x32xbf16, #tpu.memory_space<vmem>>, %arg5: memref<1x32xf32, #tpu.memory_space<vmem>>, %arg6: memref<8x32xbf16, #tpu.memory_space<vmem>>) attributes {dimension_semantics = [#tpu.dimension_semantics<parallel>], iteration_bounds = array<i64: 2>, scalar_prefetch = 0 : i64, scratch_operands = 0 : i64, tpu.core_type = #tpu.core_type<tc>, window_params = [{transform_indices = @transform_0, window_bounds = array<i64: 8, 32>}, {pipeline_mode = #tpu.pipeline_mode<synchronous>, transform_indices = @transform_1, window_bounds = array<i64: 1, 32>}, {pipeline_mode = #tpu.pipeline_mode<synchronous>, transform_indices = @transform_2, window_bounds = array<i64: 1, 32>}, {pipeline_mode = #tpu.pipeline_mode<synchronous>, transform_indices = @transform_3, window_bounds = array<i64: 32, 32>}, {pipeline_mode = #tpu.pipeline_mode<synchronous>, transform_indices = @transform_4, window_bounds = array<i64: 1, 32>}, {transform_indices = @transform_5, window_bounds = array<i64: 8, 32>}]} {
    %c0 = arith.constant 0 : index
    %c0_0 = arith.constant 0 : index
    %0 = vector.load %arg1[%c0, %c0_0] : memref<8x32xf32, #tpu.memory_space<vmem>>, vector<8x32xf32>
    %c0_1 = arith.constant 0 : index
    %c0_2 = arith.constant 0 : index
    %1 = vector.load %arg2[%c0_1, %c0_2] : memref<1x32xf32, #tpu.memory_space<vmem>>, vector<1x32xf32>
    %c0_3 = arith.constant 0 : index
    %c0_4 = arith.constant 0 : index
    %2 = vector.load %arg3[%c0_3, %c0_4] : memref<1x32xf32, #tpu.memory_space<vmem>>, vector<1x32xf32>
    %cst = arith.constant dense<0.000000e+00> : vector<8xf32>
    %3 = vector.multi_reduction <add>, %0, %cst [1] : vector<8x32xf32> to vector<8xf32>
    %4 = vector.shape_cast %3 : vector<8xf32> to vector<8x1xf32>
    %cst_5 = arith.constant 3.200000e+01 : f32
    %5 = vector.broadcast %cst_5 : f32 to vector<8x1xf32>
    %6 = arith.divf %4, %5 : vector<8x1xf32>
    %7 = vector.broadcast %6 : vector<8x1xf32> to vector<8x32xf32>
    %8 = arith.subf %0, %7 : vector<8x32xf32>
    %9 = arith.mulf %8, %8 : vector<8x32xf32>
    %cst_6 = arith.constant dense<0.000000e+00> : vector<8xf32>
    %10 = vector.multi_reduction <add>, %9, %cst_6 [1] : vector<8x32xf32> to vector<8xf32>
    %11 = vector.shape_cast %10 : vector<8xf32> to vector<8x1xf32>
    %cst_7 = arith.constant 0.0322580636 : f32
    %12 = vector.broadcast %cst_7 : f32 to vector<8x1xf32>
    %13 = arith.mulf %11, %12 : vector<8x1xf32>
    %14 = vector.broadcast %6 : vector<8x1xf32> to vector<8x32xf32>
    %15 = arith.subf %0, %14 : vector<8x32xf32>
    %16 = vector.broadcast %1 : vector<1x32xf32> to vector<8x32xf32>
    %17 = arith.mulf %16, %15 : vector<8x32xf32>
    %18 = math.sqrt %13 : vector<8x1xf32>
    %cst_8 = arith.constant 9.99999997E-7 : f32
    %19 = vector.broadcast %cst_8 : f32 to vector<8x1xf32>
    %20 = arith.addf %18, %19 : vector<8x1xf32>
    %21 = vector.broadcast %20 : vector<8x1xf32> to vector<8x32xf32>
    %22 = arith.divf %17, %21 : vector<8x32xf32>
    %23 = vector.broadcast %2 : vector<1x32xf32> to vector<8x32xf32>
    %24 = arith.addf %22, %23 : vector<8x32xf32>
    %25 = arith.truncf %24 : vector<8x32xf32> to vector<8x32xbf16>
    %c0_9 = arith.constant 0 : index
    %c0_10 = arith.constant 0 : index
    %26 = vector.load %arg4[%c0_9, %c0_10] : memref<32x32xbf16, #tpu.memory_space<vmem>>, vector<32x32xbf16>
    %cst_11 = arith.constant dense<0.000000e+00> : vector<8x32xf32>
    %27 = tpu.matmul %25, %26, %cst_11 {dimension_numbers = #tpu.dot_dimension_numbers<[1], [0], [0], [1], [0, 0, 1, 1], [], []>} : vector<8x32xbf16>, vector<32x32xbf16>, vector<8x32xf32> -> vector<8x32xf32>
    %c0_12 = arith.constant 0 : index
    %c0_13 = arith.constant 0 : index
    %28 = vector.load %arg5[%c0_12, %c0_13] : memref<1x32xf32, #tpu.memory_space<vmem>>, vector<1x32xf32>
    %29 = vector.broadcast %28 : vector<1x32xf32> to vector<8x32xf32>
    %30 = arith.addf %27, %29 : vector<8x32xf32>
    %31 = arith.truncf %30 : vector<8x32xf32> to vector<8x32xbf16>
    %c0_14 = arith.constant 0 : index
    %c0_15 = arith.constant 0 : index
    %32 = vector.load %arg6[%c0_14, %c0_15] : memref<8x32xbf16, #tpu.memory_space<vmem>>, vector<8x32xbf16>
    tpu.vector_store %arg6[%c0_14, %c0_15], %31 {strides = array<i32>} : memref<8x32xbf16, #tpu.memory_space<vmem>>, vector<8x32xbf16>,
    return
  }
  func.func @transform_0(%arg0: i32) -> (i32, i32) {
    %c0_i32 = arith.constant 0 : i32
    %c0_i32_0 = arith.constant 0 : i32
    return %arg0, %c0_i32 : i32, i32
  }
  func.func @transform_1(%arg0: i32) -> (i32, i32) {
    %c0_i32 = arith.constant 0 : i32
    %c0_i32_0 = arith.constant 0 : i32
    %c0_i32_1 = arith.constant 0 : i32
    return %c0_i32, %c0_i32_0 : i32, i32
  }
  func.func @transform_2(%arg0: i32) -> (i32, i32) {
    %c0_i32 = arith.constant 0 : i32
    %c0_i32_0 = arith.constant 0 : i32
    %c0_i32_1 = arith.constant 0 : i32
    return %c0_i32, %c0_i32_0 : i32, i32
  }
  func.func @transform_3(%arg0: i32) -> (i32, i32) {
    %c0_i32 = arith.constant 0 : i32
    %c0_i32_0 = arith.constant 0 : i32
    %c0_i32_1 = arith.constant 0 : i32
    return %c0_i32, %c0_i32_0 : i32, i32
  }
  func.func @transform_4(%arg0: i32) -> (i32, i32) {
    %c0_i32 = arith.constant 0 : i32
    %c0_i32_0 = arith.constant 0 : i32
    %c0_i32_1 = arith.constant 0 : i32
    return %c0_i32, %c0_i32_0 : i32, i32
  }
  func.func @transform_5(%arg0: i32) -> (i32, i32) {
    %c0_i32 = arith.constant 0 : i32
    %c0_i32_0 = arith.constant 0 : i32
    return %arg0, %c0_i32 : i32, i32
  }
}

module attributes {stable_mosaic.version = 11 : i64} {
  func.func @_attn_self_kernel(%arg0: i32, %arg1: memref<2xi32, #tpu.memory_space<smem>>, %arg2: memref<1x8x32xbf16, #tpu.memory_space<vmem>>, %arg3: memref<1x8x64xbf16, #tpu.memory_space<vmem>>, %arg4: memref<32x32xbf16, #tpu.memory_space<vmem>>, %arg5: memref<1x32xf32, #tpu.memory_space<vmem>>, %arg6: memref<1x8x32xf32, #tpu.memory_space<vmem>>, %arg7: memref<1x8x32xf32, #tpu.memory_space<vmem>>, %arg8: memref<8x32xf32, #tpu.memory_space<vmem>>) attributes {dimension_semantics = [#tpu.dimension_semantics<parallel>], iteration_bounds = array<i64: 2>, scalar_prefetch = 1 : i64, scratch_operands = 1 : i64, tpu.core_type = #tpu.core_type<tc>, window_params = [{transform_indices = @transform_0, window_bounds = array<i64: 1, 8, 32>}, {transform_indices = @transform_1, window_bounds = array<i64: 1, 8, 64>}, {pipeline_mode = #tpu.pipeline_mode<synchronous>, transform_indices = @transform_2, window_bounds = array<i64: 32, 32>}, {pipeline_mode = #tpu.pipeline_mode<synchronous>, transform_indices = @transform_3, window_bounds = array<i64: 1, 32>}, {transform_indices = @transform_4, window_bounds = array<i64: 1, 8, 32>}, {transform_indices = @transform_5, window_bounds = array<i64: 1, 8, 32>}]} {
    %0 = arith.index_cast %arg0 : i32 to index
    %1 = memref.load %arg1[%0] : memref<2xi32, #tpu.memory_space<smem>>
    %c0 = arith.constant 0 : index
    %c0_0 = arith.constant 0 : index
    %c0_1 = arith.constant 0 : index
    %2 = vector.load %arg2[%c0, %c0_0, %c0_1] : memref<1x8x32xbf16, #tpu.memory_space<vmem>>, vector<1x8x32xbf16>
    %3 = vector.shape_cast %2 : vector<1x8x32xbf16> to vector<8x32xbf16>
    %c0_2 = arith.constant 0 : index
    %c0_3 = arith.constant 0 : index
    %c0_4 = arith.constant 0 : index
    %4 = vector.load %arg3[%c0_2, %c0_3, %c0_4] : memref<1x8x64xbf16, #tpu.memory_space<vmem>>, vector<1x8x64xbf16>
    %5 = vector.shape_cast %4 : vector<1x8x64xbf16> to vector<8x64xbf16>
    %6 = tpu.iota {dimensions = array<i32: 0>} : vector<8x8xi32>
    %7 = tpu.iota {dimensions = array<i32: 1>} : vector<8x8xi32>
    %8 = arith.cmpi sle, %7, %6 : vector<8x8xi32>
    %9 = vector.broadcast %1 : i32 to vector<8x8xi32>
    %10 = arith.cmpi slt, %6, %9 : vector<8x8xi32>
    %11 = arith.andi %8, %10 : vector<8x8xi1>
    %cst = arith.constant 0.000000e+00 : f32
    %cst_5 = arith.constant -1.000000e+09 : f32
    %12 = vector.broadcast %cst : f32 to vector<8x8xf32>
    %13 = vector.broadcast %cst_5 : f32 to vector<8x8xf32>
    %14 = arith.select %11, %12, %13 : vector<8x8xi1>, vector<8x8xf32>
    %15 = vector.extract_strided_slice %3 {offsets = [0, 0], sizes = [8, 8], strides = [1, 1]} : vector<8x32xbf16> to vector<8x8xbf16>
    %16 = vector.extract_strided_slice %5 {offsets = [0, 0], sizes = [8, 8], strides = [1, 1]} : vector<8x64xbf16> to vector<8x8xbf16>
    %17 = vector.extract_strided_slice %5 {offsets = [0, 32], sizes = [8, 8], strides = [1, 1]} : vector<8x64xbf16> to vector<8x8xbf16>
    %cst_6 = arith.constant dense<0.000000e+00> : vector<8x8xf32>
    %18 = tpu.matmul %15, %16, %cst_6 {dimension_numbers = #tpu.dot_dimension_numbers<[1], [1], [0], [0], [0, 0, 1, 0], [], []>} : vector<8x8xbf16>, vector<8x8xbf16>, vector<8x8xf32> -> vector<8x8xf32>
    %cst_7 = arith.constant 0.353553385 : f32
    %19 = vector.broadcast %cst_7 : f32 to vector<8x8xf32>
    %20 = arith.mulf %18, %19 : vector<8x8xf32>
    %21 = arith.addf %20, %14 : vector<8x8xf32>
    %cst_8 = arith.constant dense<0xFF800000> : vector<8xf32>
    %22 = vector.multi_reduction <maximumf>, %21, %cst_8 [1] : vector<8x8xf32> to vector<8xf32>
    %23 = vector.shape_cast %22 : vector<8xf32> to vector<8x1xf32>
    %24 = vector.broadcast %23 : vector<8x1xf32> to vector<8x8xf32>
    %25 = arith.subf %21, %24 : vector<8x8xf32>
    %26 = math.exp %25 : vector<8x8xf32>
    %cst_9 = arith.constant dense<0.000000e+00> : vector<8xf32>
    %27 = vector.multi_reduction <add>, %26, %cst_9 [1] : vector<8x8xf32> to vector<8xf32>
    %28 = vector.shape_cast %27 : vector<8xf32> to vector<8x1xf32>
    %29 = tpu.reciprocal %28 {approx = true} : vector<8x1xf32> -> vector<8x1xf32>
    %30 = vector.broadcast %29 : vector<8x1xf32> to vector<8x8xf32>
    %31 = arith.mulf %26, %30 : vector<8x8xf32>
    %32 = arith.truncf %31 : vector<8x8xf32> to vector<8x8xbf16>
    %cst_10 = arith.constant dense<0.000000e+00> : vector<8x8xf32>
    %33 = tpu.matmul %32, %17, %cst_10 {dimension_numbers = #tpu.dot_dimension_numbers<[1], [0], [0], [1], [0, 0, 1, 1], [], []>} : vector<8x8xbf16>, vector<8x8xbf16>, vector<8x8xf32> -> vector<8x8xf32>
    %c0_11 = arith.constant 0 : index
    %c0_12 = arith.constant 0 : index
    %34 = vector.load %arg8[%c0_11, %c0_12] : memref<8x32xf32, #tpu.memory_space<vmem>>, vector<8x8xf32>
    tpu.vector_store %arg8[%c0_11, %c0_12], %33 {strides = array<i32>} : memref<8x32xf32, #tpu.memory_space<vmem>>, vector<8x8xf32>,
    %35 = vector.extract_strided_slice %3 {offsets = [0, 8], sizes = [8, 8], strides = [1, 1]} : vector<8x32xbf16> to vector<8x8xbf16>
    %36 = vector.extract_strided_slice %5 {offsets = [0, 8], sizes = [8, 8], strides = [1, 1]} : vector<8x64xbf16> to vector<8x8xbf16>
    %37 = vector.extract_strided_slice %5 {offsets = [0, 40], sizes = [8, 8], strides = [1, 1]} : vector<8x64xbf16> to vector<8x8xbf16>
    %cst_13 = arith.constant dense<0.000000e+00> : vector<8x8xf32>
    %38 = tpu.matmul %35, %36, %cst_13 {dimension_numbers = #tpu.dot_dimension_numbers<[1], [1], [0], [0], [0, 0, 1, 0], [], []>} : vector<8x8xbf16>, vector<8x8xbf16>, vector<8x8xf32> -> vector<8x8xf32>
    %cst_14 = arith.constant 0.353553385 : f32
    %39 = vector.broadcast %cst_14 : f32 to vector<8x8xf32>
    %40 = arith.mulf %38, %39 : vector<8x8xf32>
    %41 = arith.addf %40, %14 : vector<8x8xf32>
    %cst_15 = arith.constant dense<0xFF800000> : vector<8xf32>
    %42 = vector.multi_reduction <maximumf>, %41, %cst_15 [1] : vector<8x8xf32> to vector<8xf32>
    %43 = vector.shape_cast %42 : vector<8xf32> to vector<8x1xf32>
    %44 = vector.broadcast %43 : vector<8x1xf32> to vector<8x8xf32>
    %45 = arith.subf %41, %44 : vector<8x8xf32>
    %46 = math.exp %45 : vector<8x8xf32>
    %cst_16 = arith.constant dense<0.000000e+00> : vector<8xf32>
    %47 = vector.multi_reduction <add>, %46, %cst_16 [1] : vector<8x8xf32> to vector<8xf32>
    %48 = vector.shape_cast %47 : vector<8xf32> to vector<8x1xf32>
    %49 = tpu.reciprocal %48 {approx = true} : vector<8x1xf32> -> vector<8x1xf32>
    %50 = vector.broadcast %49 : vector<8x1xf32> to vector<8x8xf32>
    %51 = arith.mulf %46, %50 : vector<8x8xf32>
    %52 = arith.truncf %51 : vector<8x8xf32> to vector<8x8xbf16>
    %cst_17 = arith.constant dense<0.000000e+00> : vector<8x8xf32>
    %53 = tpu.matmul %52, %37, %cst_17 {dimension_numbers = #tpu.dot_dimension_numbers<[1], [0], [0], [1], [0, 0, 1, 1], [], []>} : vector<8x8xbf16>, vector<8x8xbf16>, vector<8x8xf32> -> vector<8x8xf32>
    %c0_18 = arith.constant 0 : index
    %c8 = arith.constant 8 : index
    %54 = vector.load %arg8[%c0_18, %c8] : memref<8x32xf32, #tpu.memory_space<vmem>>, vector<8x8xf32>
    tpu.vector_store %arg8[%c0_18, %c8], %53 {strides = array<i32>} : memref<8x32xf32, #tpu.memory_space<vmem>>, vector<8x8xf32>,
    %55 = vector.extract_strided_slice %3 {offsets = [0, 16], sizes = [8, 8], strides = [1, 1]} : vector<8x32xbf16> to vector<8x8xbf16>
    %56 = vector.extract_strided_slice %5 {offsets = [0, 16], sizes = [8, 8], strides = [1, 1]} : vector<8x64xbf16> to vector<8x8xbf16>
    %57 = vector.extract_strided_slice %5 {offsets = [0, 48], sizes = [8, 8], strides = [1, 1]} : vector<8x64xbf16> to vector<8x8xbf16>
    %cst_19 = arith.constant dense<0.000000e+00> : vector<8x8xf32>
    %58 = tpu.matmul %55, %56, %cst_19 {dimension_numbers = #tpu.dot_dimension_numbers<[1], [1], [0], [0], [0, 0, 1, 0], [], []>} : vector<8x8xbf16>, vector<8x8xbf16>, vector<8x8xf32> -> vector<8x8xf32>
    %cst_20 = arith.constant 0.353553385 : f32
    %59 = vector.broadcast %cst_20 : f32 to vector<8x8xf32>
    %60 = arith.mulf %58, %59 : vector<8x8xf32>
    %61 = arith.addf %60, %14 : vector<8x8xf32>
    %cst_21 = arith.constant dense<0xFF800000> : vector<8xf32>
    %62 = vector.multi_reduction <maximumf>, %61, %cst_21 [1] : vector<8x8xf32> to vector<8xf32>
    %63 = vector.shape_cast %62 : vector<8xf32> to vector<8x1xf32>
    %64 = vector.broadcast %63 : vector<8x1xf32> to vector<8x8xf32>
    %65 = arith.subf %61, %64 : vector<8x8xf32>
    %66 = math.exp %65 : vector<8x8xf32>
    %cst_22 = arith.constant dense<0.000000e+00> : vector<8xf32>
    %67 = vector.multi_reduction <add>, %66, %cst_22 [1] : vector<8x8xf32> to vector<8xf32>
    %68 = vector.shape_cast %67 : vector<8xf32> to vector<8x1xf32>
    %69 = tpu.reciprocal %68 {approx = true} : vector<8x1xf32> -> vector<8x1xf32>
    %70 = vector.broadcast %69 : vector<8x1xf32> to vector<8x8xf32>
    %71 = arith.mulf %66, %70 : vector<8x8xf32>
    %72 = arith.truncf %71 : vector<8x8xf32> to vector<8x8xbf16>
    %cst_23 = arith.constant dense<0.000000e+00> : vector<8x8xf32>
    %73 = tpu.matmul %72, %57, %cst_23 {dimension_numbers = #tpu.dot_dimension_numbers<[1], [0], [0], [1], [0, 0, 1, 1], [], []>} : vector<8x8xbf16>, vector<8x8xbf16>, vector<8x8xf32> -> vector<8x8xf32>
    %c0_24 = arith.constant 0 : index
    %c16 = arith.constant 16 : index
    %74 = vector.load %arg8[%c0_24, %c16] : memref<8x32xf32, #tpu.memory_space<vmem>>, vector<8x8xf32>
    tpu.vector_store %arg8[%c0_24, %c16], %73 {strides = array<i32>} : memref<8x32xf32, #tpu.memory_space<vmem>>, vector<8x8xf32>,
    %75 = vector.extract_strided_slice %3 {offsets = [0, 24], sizes = [8, 8], strides = [1, 1]} : vector<8x32xbf16> to vector<8x8xbf16>
    %76 = vector.extract_strided_slice %5 {offsets = [0, 24], sizes = [8, 8], strides = [1, 1]} : vector<8x64xbf16> to vector<8x8xbf16>
    %77 = vector.extract_strided_slice %5 {offsets = [0, 56], sizes = [8, 8], strides = [1, 1]} : vector<8x64xbf16> to vector<8x8xbf16>
    %cst_25 = arith.constant dense<0.000000e+00> : vector<8x8xf32>
    %78 = tpu.matmul %75, %76, %cst_25 {dimension_numbers = #tpu.dot_dimension_numbers<[1], [1], [0], [0], [0, 0, 1, 0], [], []>} : vector<8x8xbf16>, vector<8x8xbf16>, vector<8x8xf32> -> vector<8x8xf32>
    %cst_26 = arith.constant 0.353553385 : f32
    %79 = vector.broadcast %cst_26 : f32 to vector<8x8xf32>
    %80 = arith.mulf %78, %79 : vector<8x8xf32>
    %81 = arith.addf %80, %14 : vector<8x8xf32>
    %cst_27 = arith.constant dense<0xFF800000> : vector<8xf32>
    %82 = vector.multi_reduction <maximumf>, %81, %cst_27 [1] : vector<8x8xf32> to vector<8xf32>
    %83 = vector.shape_cast %82 : vector<8xf32> to vector<8x1xf32>
    %84 = vector.broadcast %83 : vector<8x1xf32> to vector<8x8xf32>
    %85 = arith.subf %81, %84 : vector<8x8xf32>
    %86 = math.exp %85 : vector<8x8xf32>
    %cst_28 = arith.constant dense<0.000000e+00> : vector<8xf32>
    %87 = vector.multi_reduction <add>, %86, %cst_28 [1] : vector<8x8xf32> to vector<8xf32>
    %88 = vector.shape_cast %87 : vector<8xf32> to vector<8x1xf32>
    %89 = tpu.reciprocal %88 {approx = true} : vector<8x1xf32> -> vector<8x1xf32>
    %90 = vector.broadcast %89 : vector<8x1xf32> to vector<8x8xf32>
    %91 = arith.mulf %86, %90 : vector<8x8xf32>
    %92 = arith.truncf %91 : vector<8x8xf32> to vector<8x8xbf16>
    %cst_29 = arith.constant dense<0.000000e+00> : vector<8x8xf32>
    %93 = tpu.matmul %92, %77, %cst_29 {dimension_numbers = #tpu.dot_dimension_numbers<[1], [0], [0], [1], [0, 0, 1, 1], [], []>} : vector<8x8xbf16>, vector<8x8xbf16>, vector<8x8xf32> -> vector<8x8xf32>
    %c0_30 = arith.constant 0 : index
    %c24 = arith.constant 24 : index
    %94 = vector.load %arg8[%c0_30, %c24] : memref<8x32xf32, #tpu.memory_space<vmem>>, vector<8x8xf32>
    tpu.vector_store %arg8[%c0_30, %c24], %93 {strides = array<i32>} : memref<8x32xf32, #tpu.memory_space<vmem>>, vector<8x8xf32>,
    %c0_31 = arith.constant 0 : index
    %c0_32 = arith.constant 0 : index
    %95 = vector.load %arg8[%c0_31, %c0_32] : memref<8x32xf32, #tpu.memory_space<vmem>>, vector<8x32xf32>
    %96 = arith.truncf %95 : vector<8x32xf32> to vector<8x32xbf16>
    %c0_33 = arith.constant 0 : index
    %c0_34 = arith.constant 0 : index
    %97 = vector.load %arg4[%c0_33, %c0_34] : memref<32x32xbf16, #tpu.memory_space<vmem>>, vector<32x32xbf16>
    %cst_35 = arith.constant dense<0.000000e+00> : vector<8x32xf32>
    %98 = tpu.matmul %96, %97, %cst_35 {dimension_numbers = #tpu.dot_dimension_numbers<[1], [0], [0], [1], [0, 0, 1, 1], [], []>} : vector<8x32xbf16>, vector<32x32xbf16>, vector<8x32xf32> -> vector<8x32xf32>
    %c0_36 = arith.constant 0 : index
    %c0_37 = arith.constant 0 : index
    %99 = vector.load %arg5[%c0_36, %c0_37] : memref<1x32xf32, #tpu.memory_space<vmem>>, vector<1x32xf32>
    %100 = vector.broadcast %99 : vector<1x32xf32> to vector<8x32xf32>
    %101 = arith.addf %98, %100 : vector<8x32xf32>
    %c0_38 = arith.constant 0 : index
    %c0_39 = arith.constant 0 : index
    %c0_40 = arith.constant 0 : index
    %102 = vector.load %arg6[%c0_38, %c0_39, %c0_40] : memref<1x8x32xf32, #tpu.memory_space<vmem>>, vector<1x8x32xf32>
    %103 = vector.shape_cast %102 : vector<1x8x32xf32> to vector<8x32xf32>
    %104 = arith.addf %101, %103 : vector<8x32xf32>
    %c0_41 = arith.constant 0 : index
    %c0_42 = arith.constant 0 : index
    %c0_43 = arith.constant 0 : index
    %105 = vector.load %arg7[%c0_41, %c0_42, %c0_43] : memref<1x8x32xf32, #tpu.memory_space<vmem>>, vector<1x8x32xf32>
    %106 = vector.shape_cast %105 : vector<1x8x32xf32> to vector<8x32xf32>
    %107 = vector.shape_cast %104 : vector<8x32xf32> to vector<1x8x32xf32>
    tpu.vector_store %arg7[%c0_41, %c0_42, %c0_43], %107 {strides = array<i32>} : memref<1x8x32xf32, #tpu.memory_space<vmem>>, vector<1x8x32xf32>,
    return
  }
  func.func @transform_0(%arg0: i32, %arg1: memref<2xi32, #tpu.memory_space<smem>>) -> (i32, i32, i32) {
    %c0_i32 = arith.constant 0 : i32
    %c0_i32_0 = arith.constant 0 : i32
    %c0_i32_1 = arith.constant 0 : i32
    return %arg0, %c0_i32, %c0_i32_0 : i32, i32, i32
  }
  func.func @transform_1(%arg0: i32, %arg1: memref<2xi32, #tpu.memory_space<smem>>) -> (i32, i32, i32) {
    %c0_i32 = arith.constant 0 : i32
    %c0_i32_0 = arith.constant 0 : i32
    %c0_i32_1 = arith.constant 0 : i32
    return %arg0, %c0_i32, %c0_i32_0 : i32, i32, i32
  }
  func.func @transform_2(%arg0: i32, %arg1: memref<2xi32, #tpu.memory_space<smem>>) -> (i32, i32) {
    %c0_i32 = arith.constant 0 : i32
    %c0_i32_0 = arith.constant 0 : i32
    %c0_i32_1 = arith.constant 0 : i32
    return %c0_i32, %c0_i32_0 : i32, i32
  }
  func.func @transform_3(%arg0: i32, %arg1: memref<2xi32, #tpu.memory_space<smem>>) -> (i32, i32) {
    %c0_i32 = arith.constant 0 : i32
    %c0_i32_0 = arith.constant 0 : i32
    %c0_i32_1 = arith.constant 0 : i32
    return %c0_i32, %c0_i32_0 : i32, i32
  }
  func.func @transform_4(%arg0: i32, %arg1: memref<2xi32, #tpu.memory_space<smem>>) -> (i32, i32, i32) {
    %c0_i32 = arith.constant 0 : i32
    %c0_i32_0 = arith.constant 0 : i32
    %c0_i32_1 = arith.constant 0 : i32
    return %arg0, %c0_i32, %c0_i32_0 : i32, i32, i32
  }
  func.func @transform_5(%arg0: i32, %arg1: memref<2xi32, #tpu.memory_space<smem>>) -> (i32, i32, i32) {
    %c0_i32 = arith.constant 0 : i32
    %c0_i32_0 = arith.constant 0 : i32
    %c0_i32_1 = arith.constant 0 : i32
    return %arg0, %c0_i32, %c0_i32_0 : i32, i32, i32
  }
}

module attributes {stable_mosaic.version = 11 : i64} {
  func.func @_ln_linear_kernel(%arg0: i32, %arg1: memref<8x32xf32, #tpu.memory_space<vmem>>, %arg2: memref<1x32xf32, #tpu.memory_space<vmem>>, %arg3: memref<1x32xf32, #tpu.memory_space<vmem>>, %arg4: memref<32x64xbf16, #tpu.memory_space<vmem>>, %arg5: memref<1x64xf32, #tpu.memory_space<vmem>>, %arg6: memref<8x64xbf16, #tpu.memory_space<vmem>>) attributes {dimension_semantics = [#tpu.dimension_semantics<parallel>], iteration_bounds = array<i64: 2>, scalar_prefetch = 0 : i64, scratch_operands = 0 : i64, tpu.core_type = #tpu.core_type<tc>, window_params = [{transform_indices = @transform_0, window_bounds = array<i64: 8, 32>}, {pipeline_mode = #tpu.pipeline_mode<synchronous>, transform_indices = @transform_1, window_bounds = array<i64: 1, 32>}, {pipeline_mode = #tpu.pipeline_mode<synchronous>, transform_indices = @transform_2, window_bounds = array<i64: 1, 32>}, {pipeline_mode = #tpu.pipeline_mode<synchronous>, transform_indices = @transform_3, window_bounds = array<i64: 32, 64>}, {pipeline_mode = #tpu.pipeline_mode<synchronous>, transform_indices = @transform_4, window_bounds = array<i64: 1, 64>}, {transform_indices = @transform_5, window_bounds = array<i64: 8, 64>}]} {
    %c0 = arith.constant 0 : index
    %c0_0 = arith.constant 0 : index
    %0 = vector.load %arg1[%c0, %c0_0] : memref<8x32xf32, #tpu.memory_space<vmem>>, vector<8x32xf32>
    %c0_1 = arith.constant 0 : index
    %c0_2 = arith.constant 0 : index
    %1 = vector.load %arg2[%c0_1, %c0_2] : memref<1x32xf32, #tpu.memory_space<vmem>>, vector<1x32xf32>
    %c0_3 = arith.constant 0 : index
    %c0_4 = arith.constant 0 : index
    %2 = vector.load %arg3[%c0_3, %c0_4] : memref<1x32xf32, #tpu.memory_space<vmem>>, vector<1x32xf32>
    %cst = arith.constant dense<0.000000e+00> : vector<8xf32>
    %3 = vector.multi_reduction <add>, %0, %cst [1] : vector<8x32xf32> to vector<8xf32>
    %4 = vector.shape_cast %3 : vector<8xf32> to vector<8x1xf32>
    %cst_5 = arith.constant 3.200000e+01 : f32
    %5 = vector.broadcast %cst_5 : f32 to vector<8x1xf32>
    %6 = arith.divf %4, %5 : vector<8x1xf32>
    %7 = vector.broadcast %6 : vector<8x1xf32> to vector<8x32xf32>
    %8 = arith.subf %0, %7 : vector<8x32xf32>
    %9 = arith.mulf %8, %8 : vector<8x32xf32>
    %cst_6 = arith.constant dense<0.000000e+00> : vector<8xf32>
    %10 = vector.multi_reduction <add>, %9, %cst_6 [1] : vector<8x32xf32> to vector<8xf32>
    %11 = vector.shape_cast %10 : vector<8xf32> to vector<8x1xf32>
    %cst_7 = arith.constant 0.0322580636 : f32
    %12 = vector.broadcast %cst_7 : f32 to vector<8x1xf32>
    %13 = arith.mulf %11, %12 : vector<8x1xf32>
    %14 = vector.broadcast %6 : vector<8x1xf32> to vector<8x32xf32>
    %15 = arith.subf %0, %14 : vector<8x32xf32>
    %16 = vector.broadcast %1 : vector<1x32xf32> to vector<8x32xf32>
    %17 = arith.mulf %16, %15 : vector<8x32xf32>
    %18 = math.sqrt %13 : vector<8x1xf32>
    %cst_8 = arith.constant 9.99999997E-7 : f32
    %19 = vector.broadcast %cst_8 : f32 to vector<8x1xf32>
    %20 = arith.addf %18, %19 : vector<8x1xf32>
    %21 = vector.broadcast %20 : vector<8x1xf32> to vector<8x32xf32>
    %22 = arith.divf %17, %21 : vector<8x32xf32>
    %23 = vector.broadcast %2 : vector<1x32xf32> to vector<8x32xf32>
    %24 = arith.addf %22, %23 : vector<8x32xf32>
    %25 = arith.truncf %24 : vector<8x32xf32> to vector<8x32xbf16>
    %c0_9 = arith.constant 0 : index
    %c0_10 = arith.constant 0 : index
    %26 = vector.load %arg4[%c0_9, %c0_10] : memref<32x64xbf16, #tpu.memory_space<vmem>>, vector<32x64xbf16>
    %cst_11 = arith.constant dense<0.000000e+00> : vector<8x64xf32>
    %27 = tpu.matmul %25, %26, %cst_11 {dimension_numbers = #tpu.dot_dimension_numbers<[1], [0], [0], [1], [0, 0, 1, 1], [], []>} : vector<8x32xbf16>, vector<32x64xbf16>, vector<8x64xf32> -> vector<8x64xf32>
    %c0_12 = arith.constant 0 : index
    %c0_13 = arith.constant 0 : index
    %28 = vector.load %arg5[%c0_12, %c0_13] : memref<1x64xf32, #tpu.memory_space<vmem>>, vector<1x64xf32>
    %29 = vector.broadcast %28 : vector<1x64xf32> to vector<8x64xf32>
    %30 = arith.addf %27, %29 : vector<8x64xf32>
    %31 = arith.truncf %30 : vector<8x64xf32> to vector<8x64xbf16>
    %c0_14 = arith.constant 0 : index
    %c0_15 = arith.constant 0 : index
    %32 = vector.load %arg6[%c0_14, %c0_15] : memref<8x64xbf16, #tpu.memory_space<vmem>>, vector<8x64xbf16>
    tpu.vector_store %arg6[%c0_14, %c0_15], %31 {strides = array<i32>} : memref<8x64xbf16, #tpu.memory_space<vmem>>, vector<8x64xbf16>,
    return
  }
  func.func @transform_0(%arg0: i32) -> (i32, i32) {
    %c0_i32 = arith.constant 0 : i32
    %c0_i32_0 = arith.constant 0 : i32
    return %arg0, %c0_i32 : i32, i32
  }
  func.func @transform_1(%arg0: i32) -> (i32, i32) {
    %c0_i32 = arith.constant 0 : i32
    %c0_i32_0 = arith.constant 0 : i32
    %c0_i32_1 = arith.constant 0 : i32
    return %c0_i32, %c0_i32_0 : i32, i32
  }
  func.func @transform_2(%arg0: i32) -> (i32, i32) {
    %c0_i32 = arith.constant 0 : i32
    %c0_i32_0 = arith.constant 0 : i32
    %c0_i32_1 = arith.constant 0 : i32
    return %c0_i32, %c0_i32_0 : i32, i32
  }
  func.func @transform_3(%arg0: i32) -> (i32, i32) {
    %c0_i32 = arith.constant 0 : i32
    %c0_i32_0 = arith.constant 0 : i32
    %c0_i32_1 = arith.constant 0 : i32
    return %c0_i32, %c0_i32_0 : i32, i32
  }
  func.func @transform_4(%arg0: i32) -> (i32, i32) {
    %c0_i32 = arith.constant 0 : i32
    %c0_i32_0 = arith.constant 0 : i32
    %c0_i32_1 = arith.constant 0 : i32
    return %c0_i32, %c0_i32_0 : i32, i32
  }
  func.func @transform_5(%arg0: i32) -> (i32, i32) {
    %c0_i32 = arith.constant 0 : i32
    %c0_i32_0 = arith.constant 0 : i32
    return %arg0, %c0_i32 : i32, i32
  }
}

module attributes {stable_mosaic.version = 11 : i64} {
  func.func @_attn_cross_kernel(%arg0: i32, %arg1: memref<1x8x32xbf16, #tpu.memory_space<vmem>>, %arg2: memref<1x8x64xbf16, #tpu.memory_space<vmem>>, %arg3: memref<1x1x8xf32, #tpu.memory_space<vmem>>, %arg4: memref<32x32xbf16, #tpu.memory_space<vmem>>, %arg5: memref<1x32xf32, #tpu.memory_space<vmem>>, %arg6: memref<1x8x32xf32, #tpu.memory_space<vmem>>, %arg7: memref<1x8x32xf32, #tpu.memory_space<vmem>>, %arg8: memref<8x32xf32, #tpu.memory_space<vmem>>) attributes {dimension_semantics = [#tpu.dimension_semantics<parallel>], iteration_bounds = array<i64: 2>, scalar_prefetch = 0 : i64, scratch_operands = 1 : i64, tpu.core_type = #tpu.core_type<tc>, window_params = [{transform_indices = @transform_0, window_bounds = array<i64: 1, 8, 32>}, {transform_indices = @transform_1, window_bounds = array<i64: 1, 8, 64>}, {transform_indices = @transform_2, window_bounds = array<i64: 1, 1, 8>}, {pipeline_mode = #tpu.pipeline_mode<synchronous>, transform_indices = @transform_3, window_bounds = array<i64: 32, 32>}, {pipeline_mode = #tpu.pipeline_mode<synchronous>, transform_indices = @transform_4, window_bounds = array<i64: 1, 32>}, {transform_indices = @transform_5, window_bounds = array<i64: 1, 8, 32>}, {transform_indices = @transform_6, window_bounds = array<i64: 1, 8, 32>}]} {
    %c0 = arith.constant 0 : index
    %c0_0 = arith.constant 0 : index
    %c0_1 = arith.constant 0 : index
    %0 = vector.load %arg1[%c0, %c0_0, %c0_1] : memref<1x8x32xbf16, #tpu.memory_space<vmem>>, vector<1x8x32xbf16>
    %1 = vector.shape_cast %0 : vector<1x8x32xbf16> to vector<8x32xbf16>
    %c0_2 = arith.constant 0 : index
    %c0_3 = arith.constant 0 : index
    %c0_4 = arith.constant 0 : index
    %2 = vector.load %arg2[%c0_2, %c0_3, %c0_4] : memref<1x8x64xbf16, #tpu.memory_space<vmem>>, vector<1x8x64xbf16>
    %3 = vector.shape_cast %2 : vector<1x8x64xbf16> to vector<8x64xbf16>
    %c0_5 = arith.constant 0 : index
    %c0_6 = arith.constant 0 : index
    %c0_7 = arith.constant 0 : index
    %4 = vector.load %arg3[%c0_5, %c0_6, %c0_7] : memref<1x1x8xf32, #tpu.memory_space<vmem>>, vector<1x1x8xf32>
    %5 = vector.shape_cast %4 : vector<1x1x8xf32> to vector<1x8xf32>
    %6 = vector.extract_strided_slice %1 {offsets = [0, 0], sizes = [8, 8], strides = [1, 1]} : vector<8x32xbf16> to vector<8x8xbf16>
    %7 = vector.extract_strided_slice %3 {offsets = [0, 0], sizes = [8, 8], strides = [1, 1]} : vector<8x64xbf16> to vector<8x8xbf16>
    %8 = vector.extract_strided_slice %3 {offsets = [0, 32], sizes = [8, 8], strides = [1, 1]} : vector<8x64xbf16> to vector<8x8xbf16>
    %cst = arith.constant dense<0.000000e+00> : vector<8x8xf32>
    %9 = tpu.matmul %6, %7, %cst {dimension_numbers = #tpu.dot_dimension_numbers<[1], [1], [0], [0], [0, 0, 1, 0], [], []>} : vector<8x8xbf16>, vector<8x8xbf16>, vector<8x8xf32> -> vector<8x8xf32>
    %cst_8 = arith.constant 0.353553385 : f32
    %10 = vector.broadcast %cst_8 : f32 to vector<8x8xf32>
    %11 = arith.mulf %9, %10 : vector<8x8xf32>
    %12 = vector.broadcast %5 : vector<1x8xf32> to vector<8x8xf32>
    %13 = arith.addf %11, %12 : vector<8x8xf32>
    %cst_9 = arith.constant dense<0xFF800000> : vector<8xf32>
    %14 = vector.multi_reduction <maximumf>, %13, %cst_9 [1] : vector<8x8xf32> to vector<8xf32>
    %15 = vector.shape_cast %14 : vector<8xf32> to vector<8x1xf32>
    %16 = vector.broadcast %15 : vector<8x1xf32> to vector<8x8xf32>
    %17 = arith.subf %13, %16 : vector<8x8xf32>
    %18 = math.exp %17 : vector<8x8xf32>
    %cst_10 = arith.constant dense<0.000000e+00> : vector<8xf32>
    %19 = vector.multi_reduction <add>, %18, %cst_10 [1] : vector<8x8xf32> to vector<8xf32>
    %20 = vector.shape_cast %19 : vector<8xf32> to vector<8x1xf32>
    %21 = tpu.reciprocal %20 {approx = true} : vector<8x1xf32> -> vector<8x1xf32>
    %22 = vector.broadcast %21 : vector<8x1xf32> to vector<8x8xf32>
    %23 = arith.mulf %18, %22 : vector<8x8xf32>
    %24 = arith.truncf %23 : vector<8x8xf32> to vector<8x8xbf16>
    %cst_11 = arith.constant dense<0.000000e+00> : vector<8x8xf32>
    %25 = tpu.matmul %24, %8, %cst_11 {dimension_numbers = #tpu.dot_dimension_numbers<[1], [0], [0], [1], [0, 0, 1, 1], [], []>} : vector<8x8xbf16>, vector<8x8xbf16>, vector<8x8xf32> -> vector<8x8xf32>
    %c0_12 = arith.constant 0 : index
    %c0_13 = arith.constant 0 : index
    %26 = vector.load %arg8[%c0_12, %c0_13] : memref<8x32xf32, #tpu.memory_space<vmem>>, vector<8x8xf32>
    tpu.vector_store %arg8[%c0_12, %c0_13], %25 {strides = array<i32>} : memref<8x32xf32, #tpu.memory_space<vmem>>, vector<8x8xf32>,
    %27 = vector.extract_strided_slice %1 {offsets = [0, 8], sizes = [8, 8], strides = [1, 1]} : vector<8x32xbf16> to vector<8x8xbf16>
    %28 = vector.extract_strided_slice %3 {offsets = [0, 8], sizes = [8, 8], strides = [1, 1]} : vector<8x64xbf16> to vector<8x8xbf16>
    %29 = vector.extract_strided_slice %3 {offsets = [0, 40], sizes = [8, 8], strides = [1, 1]} : vector<8x64xbf16> to vector<8x8xbf16>
    %cst_14 = arith.constant dense<0.000000e+00> : vector<8x8xf32>
    %30 = tpu.matmul %27, %28, %cst_14 {dimension_numbers = #tpu.dot_dimension_numbers<[1], [1], [0], [0], [0, 0, 1, 0], [], []>} : vector<8x8xbf16>, vector<8x8xbf16>, vector<8x8xf32> -> vector<8x8xf32>
    %cst_15 = arith.constant 0.353553385 : f32
    %31 = vector.broadcast %cst_15 : f32 to vector<8x8xf32>
    %32 = arith.mulf %30, %31 : vector<8x8xf32>
    %33 = vector.broadcast %5 : vector<1x8xf32> to vector<8x8xf32>
    %34 = arith.addf %32, %33 : vector<8x8xf32>
    %cst_16 = arith.constant dense<0xFF800000> : vector<8xf32>
    %35 = vector.multi_reduction <maximumf>, %34, %cst_16 [1] : vector<8x8xf32> to vector<8xf32>
    %36 = vector.shape_cast %35 : vector<8xf32> to vector<8x1xf32>
    %37 = vector.broadcast %36 : vector<8x1xf32> to vector<8x8xf32>
    %38 = arith.subf %34, %37 : vector<8x8xf32>
    %39 = math.exp %38 : vector<8x8xf32>
    %cst_17 = arith.constant dense<0.000000e+00> : vector<8xf32>
    %40 = vector.multi_reduction <add>, %39, %cst_17 [1] : vector<8x8xf32> to vector<8xf32>
    %41 = vector.shape_cast %40 : vector<8xf32> to vector<8x1xf32>
    %42 = tpu.reciprocal %41 {approx = true} : vector<8x1xf32> -> vector<8x1xf32>
    %43 = vector.broadcast %42 : vector<8x1xf32> to vector<8x8xf32>
    %44 = arith.mulf %39, %43 : vector<8x8xf32>
    %45 = arith.truncf %44 : vector<8x8xf32> to vector<8x8xbf16>
    %cst_18 = arith.constant dense<0.000000e+00> : vector<8x8xf32>
    %46 = tpu.matmul %45, %29, %cst_18 {dimension_numbers = #tpu.dot_dimension_numbers<[1], [0], [0], [1], [0, 0, 1, 1], [], []>} : vector<8x8xbf16>, vector<8x8xbf16>, vector<8x8xf32> -> vector<8x8xf32>
    %c0_19 = arith.constant 0 : index
    %c8 = arith.constant 8 : index
    %47 = vector.load %arg8[%c0_19, %c8] : memref<8x32xf32, #tpu.memory_space<vmem>>, vector<8x8xf32>
    tpu.vector_store %arg8[%c0_19, %c8], %46 {strides = array<i32>} : memref<8x32xf32, #tpu.memory_space<vmem>>, vector<8x8xf32>,
    %48 = vector.extract_strided_slice %1 {offsets = [0, 16], sizes = [8, 8], strides = [1, 1]} : vector<8x32xbf16> to vector<8x8xbf16>
    %49 = vector.extract_strided_slice %3 {offsets = [0, 16], sizes = [8, 8], strides = [1, 1]} : vector<8x64xbf16> to vector<8x8xbf16>
    %50 = vector.extract_strided_slice %3 {offsets = [0, 48], sizes = [8, 8], strides = [1, 1]} : vector<8x64xbf16> to vector<8x8xbf16>
    %cst_20 = arith.constant dense<0.000000e+00> : vector<8x8xf32>
    %51 = tpu.matmul %48, %49, %cst_20 {dimension_numbers = #tpu.dot_dimension_numbers<[1], [1], [0], [0], [0, 0, 1, 0], [], []>} : vector<8x8xbf16>, vector<8x8xbf16>, vector<8x8xf32> -> vector<8x8xf32>
    %cst_21 = arith.constant 0.353553385 : f32
    %52 = vector.broadcast %cst_21 : f32 to vector<8x8xf32>
    %53 = arith.mulf %51, %52 : vector<8x8xf32>
    %54 = vector.broadcast %5 : vector<1x8xf32> to vector<8x8xf32>
    %55 = arith.addf %53, %54 : vector<8x8xf32>
    %cst_22 = arith.constant dense<0xFF800000> : vector<8xf32>
    %56 = vector.multi_reduction <maximumf>, %55, %cst_22 [1] : vector<8x8xf32> to vector<8xf32>
    %57 = vector.shape_cast %56 : vector<8xf32> to vector<8x1xf32>
    %58 = vector.broadcast %57 : vector<8x1xf32> to vector<8x8xf32>
    %59 = arith.subf %55, %58 : vector<8x8xf32>
    %60 = math.exp %59 : vector<8x8xf32>
    %cst_23 = arith.constant dense<0.000000e+00> : vector<8xf32>
    %61 = vector.multi_reduction <add>, %60, %cst_23 [1] : vector<8x8xf32> to vector<8xf32>
    %62 = vector.shape_cast %61 : vector<8xf32> to vector<8x1xf32>
    %63 = tpu.reciprocal %62 {approx = true} : vector<8x1xf32> -> vector<8x1xf32>
    %64 = vector.broadcast %63 : vector<8x1xf32> to vector<8x8xf32>
    %65 = arith.mulf %60, %64 : vector<8x8xf32>
    %66 = arith.truncf %65 : vector<8x8xf32> to vector<8x8xbf16>
    %cst_24 = arith.constant dense<0.000000e+00> : vector<8x8xf32>
    %67 = tpu.matmul %66, %50, %cst_24 {dimension_numbers = #tpu.dot_dimension_numbers<[1], [0], [0], [1], [0, 0, 1, 1], [], []>} : vector<8x8xbf16>, vector<8x8xbf16>, vector<8x8xf32> -> vector<8x8xf32>
    %c0_25 = arith.constant 0 : index
    %c16 = arith.constant 16 : index
    %68 = vector.load %arg8[%c0_25, %c16] : memref<8x32xf32, #tpu.memory_space<vmem>>, vector<8x8xf32>
    tpu.vector_store %arg8[%c0_25, %c16], %67 {strides = array<i32>} : memref<8x32xf32, #tpu.memory_space<vmem>>, vector<8x8xf32>,
    %69 = vector.extract_strided_slice %1 {offsets = [0, 24], sizes = [8, 8], strides = [1, 1]} : vector<8x32xbf16> to vector<8x8xbf16>
    %70 = vector.extract_strided_slice %3 {offsets = [0, 24], sizes = [8, 8], strides = [1, 1]} : vector<8x64xbf16> to vector<8x8xbf16>
    %71 = vector.extract_strided_slice %3 {offsets = [0, 56], sizes = [8, 8], strides = [1, 1]} : vector<8x64xbf16> to vector<8x8xbf16>
    %cst_26 = arith.constant dense<0.000000e+00> : vector<8x8xf32>
    %72 = tpu.matmul %69, %70, %cst_26 {dimension_numbers = #tpu.dot_dimension_numbers<[1], [1], [0], [0], [0, 0, 1, 0], [], []>} : vector<8x8xbf16>, vector<8x8xbf16>, vector<8x8xf32> -> vector<8x8xf32>
    %cst_27 = arith.constant 0.353553385 : f32
    %73 = vector.broadcast %cst_27 : f32 to vector<8x8xf32>
    %74 = arith.mulf %72, %73 : vector<8x8xf32>
    %75 = vector.broadcast %5 : vector<1x8xf32> to vector<8x8xf32>
    %76 = arith.addf %74, %75 : vector<8x8xf32>
    %cst_28 = arith.constant dense<0xFF800000> : vector<8xf32>
    %77 = vector.multi_reduction <maximumf>, %76, %cst_28 [1] : vector<8x8xf32> to vector<8xf32>
    %78 = vector.shape_cast %77 : vector<8xf32> to vector<8x1xf32>
    %79 = vector.broadcast %78 : vector<8x1xf32> to vector<8x8xf32>
    %80 = arith.subf %76, %79 : vector<8x8xf32>
    %81 = math.exp %80 : vector<8x8xf32>
    %cst_29 = arith.constant dense<0.000000e+00> : vector<8xf32>
    %82 = vector.multi_reduction <add>, %81, %cst_29 [1] : vector<8x8xf32> to vector<8xf32>
    %83 = vector.shape_cast %82 : vector<8xf32> to vector<8x1xf32>
    %84 = tpu.reciprocal %83 {approx = true} : vector<8x1xf32> -> vector<8x1xf32>
    %85 = vector.broadcast %84 : vector<8x1xf32> to vector<8x8xf32>
    %86 = arith.mulf %81, %85 : vector<8x8xf32>
    %87 = arith.truncf %86 : vector<8x8xf32> to vector<8x8xbf16>
    %cst_30 = arith.constant dense<0.000000e+00> : vector<8x8xf32>
    %88 = tpu.matmul %87, %71, %cst_30 {dimension_numbers = #tpu.dot_dimension_numbers<[1], [0], [0], [1], [0, 0, 1, 1], [], []>} : vector<8x8xbf16>, vector<8x8xbf16>, vector<8x8xf32> -> vector<8x8xf32>
    %c0_31 = arith.constant 0 : index
    %c24 = arith.constant 24 : index
    %89 = vector.load %arg8[%c0_31, %c24] : memref<8x32xf32, #tpu.memory_space<vmem>>, vector<8x8xf32>
    tpu.vector_store %arg8[%c0_31, %c24], %88 {strides = array<i32>} : memref<8x32xf32, #tpu.memory_space<vmem>>, vector<8x8xf32>,
    %c0_32 = arith.constant 0 : index
    %c0_33 = arith.constant 0 : index
    %90 = vector.load %arg8[%c0_32, %c0_33] : memref<8x32xf32, #tpu.memory_space<vmem>>, vector<8x32xf32>
    %91 = arith.truncf %90 : vector<8x32xf32> to vector<8x32xbf16>
    %c0_34 = arith.constant 0 : index
    %c0_35 = arith.constant 0 : index
    %92 = vector.load %arg4[%c0_34, %c0_35] : memref<32x32xbf16, #tpu.memory_space<vmem>>, vector<32x32xbf16>
    %cst_36 = arith.constant dense<0.000000e+00> : vector<8x32xf32>
    %93 = tpu.matmul %91, %92, %cst_36 {dimension_numbers = #tpu.dot_dimension_numbers<[1], [0], [0], [1], [0, 0, 1, 1], [], []>} : vector<8x32xbf16>, vector<32x32xbf16>, vector<8x32xf32> -> vector<8x32xf32>
    %c0_37 = arith.constant 0 : index
    %c0_38 = arith.constant 0 : index
    %94 = vector.load %arg5[%c0_37, %c0_38] : memref<1x32xf32, #tpu.memory_space<vmem>>, vector<1x32xf32>
    %95 = vector.broadcast %94 : vector<1x32xf32> to vector<8x32xf32>
    %96 = arith.addf %93, %95 : vector<8x32xf32>
    %c0_39 = arith.constant 0 : index
    %c0_40 = arith.constant 0 : index
    %c0_41 = arith.constant 0 : index
    %97 = vector.load %arg6[%c0_39, %c0_40, %c0_41] : memref<1x8x32xf32, #tpu.memory_space<vmem>>, vector<1x8x32xf32>
    %98 = vector.shape_cast %97 : vector<1x8x32xf32> to vector<8x32xf32>
    %99 = arith.addf %96, %98 : vector<8x32xf32>
    %c0_42 = arith.constant 0 : index
    %c0_43 = arith.constant 0 : index
    %c0_44 = arith.constant 0 : index
    %100 = vector.load %arg7[%c0_42, %c0_43, %c0_44] : memref<1x8x32xf32, #tpu.memory_space<vmem>>, vector<1x8x32xf32>
    %101 = vector.shape_cast %100 : vector<1x8x32xf32> to vector<8x32xf32>
    %102 = vector.shape_cast %99 : vector<8x32xf32> to vector<1x8x32xf32>
    tpu.vector_store %arg7[%c0_42, %c0_43, %c0_44], %102 {strides = array<i32>} : memref<1x8x32xf32, #tpu.memory_space<vmem>>, vector<1x8x32xf32>,
    return
  }
  func.func @transform_0(%arg0: i32) -> (i32, i32, i32) {
    %c0_i32 = arith.constant 0 : i32
    %c0_i32_0 = arith.constant 0 : i32
    %c0_i32_1 = arith.constant 0 : i32
    return %arg0, %c0_i32, %c0_i32_0 : i32, i32, i32
  }
  func.func @transform_1(%arg0: i32) -> (i32, i32, i32) {
    %c0_i32 = arith.constant 0 : i32
    %c0_i32_0 = arith.constant 0 : i32
    %c0_i32_1 = arith.constant 0 : i32
    return %arg0, %c0_i32, %c0_i32_0 : i32, i32, i32
  }
  func.func @transform_2(%arg0: i32) -> (i32, i32, i32) {
    %c0_i32 = arith.constant 0 : i32
    %c0_i32_0 = arith.constant 0 : i32
    %c0_i32_1 = arith.constant 0 : i32
    return %arg0, %c0_i32, %c0_i32_0 : i32, i32, i32
  }
  func.func @transform_3(%arg0: i32) -> (i32, i32) {
    %c0_i32 = arith.constant 0 : i32
    %c0_i32_0 = arith.constant 0 : i32
    %c0_i32_1 = arith.constant 0 : i32
    return %c0_i32, %c0_i32_0 : i32, i32
  }
  func.func @transform_4(%arg0: i32) -> (i32, i32) {
    %c0_i32 = arith.constant 0 : i32
    %c0_i32_0 = arith.constant 0 : i32
    %c0_i32_1 = arith.constant 0 : i32
    return %c0_i32, %c0_i32_0 : i32, i32
  }
  func.func @transform_5(%arg0: i32) -> (i32, i32, i32) {
    %c0_i32 = arith.constant 0 : i32
    %c0_i32_0 = arith.constant 0 : i32
    %c0_i32_1 = arith.constant 0 : i32
    return %arg0, %c0_i32, %c0_i32_0 : i32, i32, i32
  }
  func.func @transform_6(%arg0: i32) -> (i32, i32, i32) {
    %c0_i32 = arith.constant 0 : i32
    %c0_i32_0 = arith.constant 0 : i32
    %c0_i32_1 = arith.constant 0 : i32
    return %arg0, %c0_i32, %c0_i32_0 : i32, i32, i32
  }
}

module attributes {stable_mosaic.version = 11 : i64} {
  func.func @_layernorm_kernel(%arg0: i32, %arg1: memref<8x32xf32, #tpu.memory_space<vmem>>, %arg2: memref<1x32xf32, #tpu.memory_space<vmem>>, %arg3: memref<1x32xf32, #tpu.memory_space<vmem>>, %arg4: memref<8x32xf32, #tpu.memory_space<vmem>>) attributes {dimension_semantics = [#tpu.dimension_semantics<parallel>], iteration_bounds = array<i64: 2>, scalar_prefetch = 0 : i64, scratch_operands = 0 : i64, tpu.core_type = #tpu.core_type<tc>, window_params = [{transform_indices = @transform_0, window_bounds = array<i64: 8, 32>}, {pipeline_mode = #tpu.pipeline_mode<synchronous>, transform_indices = @transform_1, window_bounds = array<i64: 1, 32>}, {pipeline_mode = #tpu.pipeline_mode<synchronous>, transform_indices = @transform_2, window_bounds = array<i64: 1, 32>}, {transform_indices = @transform_3, window_bounds = array<i64: 8, 32>}]} {
    %c0 = arith.constant 0 : index
    %c0_0 = arith.constant 0 : index
    %0 = vector.load %arg1[%c0, %c0_0] : memref<8x32xf32, #tpu.memory_space<vmem>>, vector<8x32xf32>
    %c0_1 = arith.constant 0 : index
    %c0_2 = arith.constant 0 : index
    %1 = vector.load %arg2[%c0_1, %c0_2] : memref<1x32xf32, #tpu.memory_space<vmem>>, vector<1x32xf32>
    %c0_3 = arith.constant 0 : index
    %c0_4 = arith.constant 0 : index
    %2 = vector.load %arg3[%c0_3, %c0_4] : memref<1x32xf32, #tpu.memory_space<vmem>>, vector<1x32xf32>
    %cst = arith.constant dense<0.000000e+00> : vector<8xf32>
    %3 = vector.multi_reduction <add>, %0, %cst [1] : vector<8x32xf32> to vector<8xf32>
    %4 = vector.shape_cast %3 : vector<8xf32> to vector<8x1xf32>
    %cst_5 = arith.constant 3.200000e+01 : f32
    %5 = vector.broadcast %cst_5 : f32 to vector<8x1xf32>
    %6 = arith.divf %4, %5 : vector<8x1xf32>
    %7 = vector.broadcast %6 : vector<8x1xf32> to vector<8x32xf32>
    %8 = arith.subf %0, %7 : vector<8x32xf32>
    %9 = arith.mulf %8, %8 : vector<8x32xf32>
    %cst_6 = arith.constant dense<0.000000e+00> : vector<8xf32>
    %10 = vector.multi_reduction <add>, %9, %cst_6 [1] : vector<8x32xf32> to vector<8xf32>
    %11 = vector.shape_cast %10 : vector<8xf32> to vector<8x1xf32>
    %cst_7 = arith.constant 0.0322580636 : f32
    %12 = vector.broadcast %cst_7 : f32 to vector<8x1xf32>
    %13 = arith.mulf %11, %12 : vector<8x1xf32>
    %14 = vector.broadcast %6 : vector<8x1xf32> to vector<8x32xf32>
    %15 = arith.subf %0, %14 : vector<8x32xf32>
    %16 = vector.broadcast %1 : vector<1x32xf32> to vector<8x32xf32>
    %17 = arith.mulf %16, %15 : vector<8x32xf32>
    %18 = math.sqrt %13 : vector<8x1xf32>
    %cst_8 = arith.constant 9.99999997E-7 : f32
    %19 = vector.broadcast %cst_8 : f32 to vector<8x1xf32>
    %20 = arith.addf %18, %19 : vector<8x1xf32>
    %21 = vector.broadcast %20 : vector<8x1xf32> to vector<8x32xf32>
    %22 = arith.divf %17, %21 : vector<8x32xf32>
    %23 = vector.broadcast %2 : vector<1x32xf32> to vector<8x32xf32>
    %24 = arith.addf %22, %23 : vector<8x32xf32>
    %c0_9 = arith.constant 0 : index
    %c0_10 = arith.constant 0 : index
    %25 = vector.load %arg4[%c0_9, %c0_10] : memref<8x32xf32, #tpu.memory_space<vmem>>, vector<8x32xf32>
    tpu.vector_store %arg4[%c0_9, %c0_10], %24 {strides = array<i32>} : memref<8x32xf32, #tpu.memory_space<vmem>>, vector<8x32xf32>,
    return
  }
  func.func @transform_0(%arg0: i32) -> (i32, i32) {
    %c0_i32 = arith.constant 0 : i32
    %c0_i32_0 = arith.constant 0 : i32
    return %arg0, %c0_i32 : i32, i32
  }
  func.func @transform_1(%arg0: i32) -> (i32, i32) {
    %c0_i32 = arith.constant 0 : i32
    %c0_i32_0 = arith.constant 0 : i32
    %c0_i32_1 = arith.constant 0 : i32
    return %c0_i32, %c0_i32_0 : i32, i32
  }
  func.func @transform_2(%arg0: i32) -> (i32, i32) {
    %c0_i32 = arith.constant 0 : i32
    %c0_i32_0 = arith.constant 0 : i32
    %c0_i32_1 = arith.constant 0 : i32
    return %c0_i32, %c0_i32_0 : i32, i32
  }
  func.func @transform_3(%arg0: i32) -> (i32, i32) {
    %c0_i32 = arith.constant 0 : i32
    %c0_i32_0 = arith.constant 0 : i32
    return %arg0, %c0_i32 : i32, i32
  }
}

module attributes {stable_mosaic.version = 11 : i64} {
  func.func @_ffn_kernel(%arg0: i32, %arg1: memref<8x32xf32, #tpu.memory_space<vmem>>, %arg2: memref<1x32xf32, #tpu.memory_space<vmem>>, %arg3: memref<1x32xf32, #tpu.memory_space<vmem>>, %arg4: memref<32x64xbf16, #tpu.memory_space<vmem>>, %arg5: memref<1x64xf32, #tpu.memory_space<vmem>>, %arg6: memref<64x32xbf16, #tpu.memory_space<vmem>>, %arg7: memref<1x32xf32, #tpu.memory_space<vmem>>, %arg8: memref<8x32xf32, #tpu.memory_space<vmem>>) attributes {dimension_semantics = [#tpu.dimension_semantics<parallel>], iteration_bounds = array<i64: 2>, scalar_prefetch = 0 : i64, scratch_operands = 0 : i64, tpu.core_type = #tpu.core_type<tc>, window_params = [{transform_indices = @transform_0, window_bounds = array<i64: 8, 32>}, {pipeline_mode = #tpu.pipeline_mode<synchronous>, transform_indices = @transform_1, window_bounds = array<i64: 1, 32>}, {pipeline_mode = #tpu.pipeline_mode<synchronous>, transform_indices = @transform_2, window_bounds = array<i64: 1, 32>}, {pipeline_mode = #tpu.pipeline_mode<synchronous>, transform_indices = @transform_3, window_bounds = array<i64: 32, 64>}, {pipeline_mode = #tpu.pipeline_mode<synchronous>, transform_indices = @transform_4, window_bounds = array<i64: 1, 64>}, {pipeline_mode = #tpu.pipeline_mode<synchronous>, transform_indices = @transform_5, window_bounds = array<i64: 64, 32>}, {pipeline_mode = #tpu.pipeline_mode<synchronous>, transform_indices = @transform_6, window_bounds = array<i64: 1, 32>}, {transform_indices = @transform_7, window_bounds = array<i64: 8, 32>}]} {
    %c0 = arith.constant 0 : index
    %c0_0 = arith.constant 0 : index
    %0 = vector.load %arg1[%c0, %c0_0] : memref<8x32xf32, #tpu.memory_space<vmem>>, vector<8x32xf32>
    %c0_1 = arith.constant 0 : index
    %c0_2 = arith.constant 0 : index
    %1 = vector.load %arg2[%c0_1, %c0_2] : memref<1x32xf32, #tpu.memory_space<vmem>>, vector<1x32xf32>
    %c0_3 = arith.constant 0 : index
    %c0_4 = arith.constant 0 : index
    %2 = vector.load %arg3[%c0_3, %c0_4] : memref<1x32xf32, #tpu.memory_space<vmem>>, vector<1x32xf32>
    %cst = arith.constant dense<0.000000e+00> : vector<8xf32>
    %3 = vector.multi_reduction <add>, %0, %cst [1] : vector<8x32xf32> to vector<8xf32>
    %4 = vector.shape_cast %3 : vector<8xf32> to vector<8x1xf32>
    %cst_5 = arith.constant 3.200000e+01 : f32
    %5 = vector.broadcast %cst_5 : f32 to vector<8x1xf32>
    %6 = arith.divf %4, %5 : vector<8x1xf32>
    %7 = vector.broadcast %6 : vector<8x1xf32> to vector<8x32xf32>
    %8 = arith.subf %0, %7 : vector<8x32xf32>
    %9 = arith.mulf %8, %8 : vector<8x32xf32>
    %cst_6 = arith.constant dense<0.000000e+00> : vector<8xf32>
    %10 = vector.multi_reduction <add>, %9, %cst_6 [1] : vector<8x32xf32> to vector<8xf32>
    %11 = vector.shape_cast %10 : vector<8xf32> to vector<8x1xf32>
    %cst_7 = arith.constant 0.0322580636 : f32
    %12 = vector.broadcast %cst_7 : f32 to vector<8x1xf32>
    %13 = arith.mulf %11, %12 : vector<8x1xf32>
    %14 = vector.broadcast %6 : vector<8x1xf32> to vector<8x32xf32>
    %15 = arith.subf %0, %14 : vector<8x32xf32>
    %16 = vector.broadcast %1 : vector<1x32xf32> to vector<8x32xf32>
    %17 = arith.mulf %16, %15 : vector<8x32xf32>
    %18 = math.sqrt %13 : vector<8x1xf32>
    %cst_8 = arith.constant 9.99999997E-7 : f32
    %19 = vector.broadcast %cst_8 : f32 to vector<8x1xf32>
    %20 = arith.addf %18, %19 : vector<8x1xf32>
    %21 = vector.broadcast %20 : vector<8x1xf32> to vector<8x32xf32>
    %22 = arith.divf %17, %21 : vector<8x32xf32>
    %23 = vector.broadcast %2 : vector<1x32xf32> to vector<8x32xf32>
    %24 = arith.addf %22, %23 : vector<8x32xf32>
    %25 = arith.truncf %24 : vector<8x32xf32> to vector<8x32xbf16>
    %c0_9 = arith.constant 0 : index
    %c0_10 = arith.constant 0 : index
    %26 = vector.load %arg4[%c0_9, %c0_10] : memref<32x64xbf16, #tpu.memory_space<vmem>>, vector<32x64xbf16>
    %cst_11 = arith.constant dense<0.000000e+00> : vector<8x64xf32>
    %27 = tpu.matmul %25, %26, %cst_11 {dimension_numbers = #tpu.dot_dimension_numbers<[1], [0], [0], [1], [0, 0, 1, 1], [], []>} : vector<8x32xbf16>, vector<32x64xbf16>, vector<8x64xf32> -> vector<8x64xf32>
    %c0_12 = arith.constant 0 : index
    %c0_13 = arith.constant 0 : index
    %28 = vector.load %arg5[%c0_12, %c0_13] : memref<1x64xf32, #tpu.memory_space<vmem>>, vector<1x64xf32>
    %29 = vector.broadcast %28 : vector<1x64xf32> to vector<8x64xf32>
    %30 = arith.addf %27, %29 : vector<8x64xf32>
    %cst_14 = arith.constant 0.000000e+00 : f32
    %31 = vector.broadcast %cst_14 : f32 to vector<8x64xf32>
    %32 = arith.maximumf %30, %31 : vector<8x64xf32>
    %33 = arith.truncf %32 : vector<8x64xf32> to vector<8x64xbf16>
    %c0_15 = arith.constant 0 : index
    %c0_16 = arith.constant 0 : index
    %34 = vector.load %arg6[%c0_15, %c0_16] : memref<64x32xbf16, #tpu.memory_space<vmem>>, vector<64x32xbf16>
    %cst_17 = arith.constant dense<0.000000e+00> : vector<8x32xf32>
    %35 = tpu.matmul %33, %34, %cst_17 {dimension_numbers = #tpu.dot_dimension_numbers<[1], [0], [0], [1], [0, 0, 1, 1], [], []>} : vector<8x64xbf16>, vector<64x32xbf16>, vector<8x32xf32> -> vector<8x32xf32>
    %c0_18 = arith.constant 0 : index
    %c0_19 = arith.constant 0 : index
    %36 = vector.load %arg7[%c0_18, %c0_19] : memref<1x32xf32, #tpu.memory_space<vmem>>, vector<1x32xf32>
    %37 = vector.broadcast %36 : vector<1x32xf32> to vector<8x32xf32>
    %38 = arith.addf %35, %37 : vector<8x32xf32>
    %39 = arith.addf %38, %0 : vector<8x32xf32>
    %c0_20 = arith.constant 0 : index
    %c0_21 = arith.constant 0 : index
    %40 = vector.load %arg8[%c0_20, %c0_21] : memref<8x32xf32, #tpu.memory_space<vmem>>, vector<8x32xf32>
    tpu.vector_store %arg8[%c0_20, %c0_21], %39 {strides = array<i32>} : memref<8x32xf32, #tpu.memory_space<vmem>>, vector<8x32xf32>,
    return
  }
  func.func @transform_0(%arg0: i32) -> (i32, i32) {
    %c0_i32 = arith.constant 0 : i32
    %c0_i32_0 = arith.constant 0 : i32
    return %arg0, %c0_i32 : i32, i32
  }
  func.func @transform_1(%arg0: i32) -> (i32, i32) {
    %c0_i32 = arith.constant 0 : i32
    %c0_i32_0 = arith.constant 0 : i32
    %c0_i32_1 = arith.constant 0 : i32
    return %c0_i32, %c0_i32_0 : i32, i32
  }
  func.func @transform_2(%arg0: i32) -> (i32, i32) {
    %c0_i32 = arith.constant 0 : i32
    %c0_i32_0 = arith.constant 0 : i32
    %c0_i32_1 = arith.constant 0 : i32
    return %c0_i32, %c0_i32_0 : i32, i32
  }
  func.func @transform_3(%arg0: i32) -> (i32, i32) {
    %c0_i32 = arith.constant 0 : i32
    %c0_i32_0 = arith.constant 0 : i32
    %c0_i32_1 = arith.constant 0 : i32
    return %c0_i32, %c0_i32_0 : i32, i32
  }
  func.func @transform_4(%arg0: i32) -> (i32, i32) {
    %c0_i32 = arith.constant 0 : i32
    %c0_i32_0 = arith.constant 0 : i32
    %c0_i32_1 = arith.constant 0 : i32
    return %c0_i32, %c0_i32_0 : i32, i32
  }
  func.func @transform_5(%arg0: i32) -> (i32, i32) {
    %c0_i32 = arith.constant 0 : i32
    %c0_i32_0 = arith.constant 0 : i32
    %c0_i32_1 = arith.constant 0 : i32
    return %c0_i32, %c0_i32_0 : i32, i32
  }
  func.func @transform_6(%arg0: i32) -> (i32, i32) {
    %c0_i32 = arith.constant 0 : i32
    %c0_i32_0 = arith.constant 0 : i32
    %c0_i32_1 = arith.constant 0 : i32
    return %c0_i32, %c0_i32_0 : i32, i32
  }
  func.func @transform_7(%arg0: i32) -> (i32, i32) {
    %c0_i32 = arith.constant 0 : i32
    %c0_i32_0 = arith.constant 0 : i32
    return %arg0, %c0_i32 : i32, i32
  }
}

</mosaic_0001>

<bundles_post_ra>
// kernel: alternating_decoder_forward.15
= control target key start
LH: loop header
LB: loop body
LE: loop exit
PB: predicated region body
PF: predicated region fallthrough
CT: control target
= control target key end

     0   :  { %s465_s18 = smov 0   ;;  %s504_s0 = inlined_call_operand.vmem [shape: f32[16,32], index: 0, kind: input, shape index: {}]   ;;  %s505_s1 = inlined_call_operand.vmem [shape: f32[1,32], index: 1, kind: input, shape index: {}]   ;;  %s506_s2 = inlined_call_operand.vmem [shape: f32[1,32], index: 2, kind: input, shape index: {}]   ;;  %s507_s3 = inlined_call_operand.vmem [shape: bf16[32,32], index: 3, kind: input, shape index: {}]   ;;  %s508_s4 = inlined_call_operand.vmem [shape: f32[1,32], index: 4, kind: input, shape index: {}]   ;;  %s509_s5 = inlined_call_operand.vmem [shape: bf16[16,32], index: 5, kind: output, shape index: {}]  }
   0x1 LB: > { %s383_s19 = sadd.s32 4294967295, %s431_s18   ;;  %p387_p0 = scmp.ge.s32.totalorder %s431_s18, 1  ;;  %s431_s18 = sphi %s465_s18, %s15_s18  }
   0x2   : > { %p186_p1 = scmp.lt.s32.totalorder %s431_s18, 3 }
   0x4   : > { %p187_p2 = pnand %p387_p0, %p186_p1 }
   0x5   : > { %p212_p3 = scmp.lt.s32.totalorder (!%p187_p2), %s383_s19, 1  ;;  %vm224_vm0 = vcmask (!%p187_p2), 261120   ;;  %v419_v7 = vld [vmem:[%s507_s3] sm:$0xff] (!%p187_p2)   ;;  %v433_v8 = vmov (!%p187_p2), 0.0   ;;  %vm434_vm1 = vmmov (!%p187_p2), 0   ;;  %v420_v9 = vld [vmem:[%s507_s3 + $0x8] sm:$0xff] (!%p187_p2)  }
   0x6   : > { %190 = sbr.rel (%p187_p2) target bundleno = 562 (0x232), region = 40  ;;  %401 = vmatprep.subr.bf16.mxu0 (!%p187_p2), %v433_v8  ;;  %405 = vmatprep.mubr.msk.bf16.mxu0 (!%p187_p2), %vm434_vm1, %v433_v8  ;;  %v390_v18 = vld [vmem:[%s505_s1] ss:$0 sm:$0xff] (!%p187_p2)  ;;  %vm328_vm4 = vcmask (!%p187_p2), 257024  }
   0x7   : > { %402 = vmatpush3.bf16.msra.mxu0 (!%p187_p2), %v419_v7  ;;  %v391_v21 = vld [vmem:[%s506_s2] ss:$0 sm:$0xff] (!%p187_p2) }
   0x8   : > { %403 = vmatprep.subr.bf16.mxu0 (!%p187_p2), %v433_v8  ;;  %v392_v25 = vld [vmem:[%s508_s4] ss:$0 sm:$0xff] (!%p187_p2) }
   0xb   : > { %404 = vmatpush3.bf16.msra.mxu0 (!%p187_p2), %v420_v9 }
   0xd   : > { %s511_s19 = smov (!%p212_p3, %s383_s19), 1 }
   0xe   : > { %s388_s20 = sshll.u32 %s511_s19, 3  ;;  %s389_s9 = sshll.u32 %s511_s19, 2 }
   0xf   : > { %s215_s23 = scalar_lea.vmem %s504_s0, %s388_s20  ;;  %s219_s12 = scalar_lea.vmem %s509_s5, %s389_s9 }
  0x10   : > { %v221_v0 = vld [vmem:[%s215_s23] sm:$0xff] }
  0x11   : > { %v225_v1 = vsel %vm224_vm0, %v221_v0, 0.0 }
  0x12   : > { %226 = vadd.xlane.f32.xlu0 %v225_v1 }
  0x9f   : > { %v227_v2 = vpop.xlane.xlu0 %226 }
  0xa0   : > { %v229_v3 = vmul.f32 0.03125, %v227_v2 }
  0xa2   : > { %v230_v4 = vsub.f32 %v221_v0, %v229_v3 }
  0xa4   : > { %v231_v5 = vmul.f32 %v230_v4, %v230_v4  ;;  %v242_v19 = vmul.f32 %v390_v18, %v230_v4 }
  0xa6   : > { %v232_v6 = vsel %vm224_vm0, %v231_v5, 0.0 }
  0xa7   : > { %233 = vadd.xlane.f32.xlu0 %v232_v6 }
 0x134   : > { %v234_v10 = vpop.xlane.xlu0 %233 }
 0x135   : > { %v235_v11 = vmul.f32 0.032258064, %v234_v10 }
 0x137   : > { %421 = vrsqrt.f32 %v235_v11  ;;  %vm245_vm2 = vcmp.eq.f32.partialorder %v235_v11, inf  ;;  %v248_v14 = vand.u32 2147483648, %v235_v11  ;;  %vm247_vm3 = vcmp.eq.f32.partialorder %v235_v11, 0.0 }
 0x141   : > { %v422_v12 = vpop.eup %421 }
 0x142   : > { %v244_v13 = vmul.f32 %v422_v12, %v235_v11 }
 0x144   : > { %v246_v15 = vsel %vm245_vm2, %v235_v11, %v244_v13 }
 0x145   : > { %v249_v16 = vsel %vm247_vm3, %v248_v14, %v246_v15 }
 0x146   : > { %v250_v17 = vadd.f32 1e-06, %v249_v16 }
 0x148   : > { %423 = vrcp.f32 %v250_v17 }
 0x152   : > { %v424_v20 = vpop.eup %423 }
 0x153   : > { %v252_v22 = vmul.f32 %v424_v20, %v242_v19 }
 0x155   : > { %v259_v23 = vadd.f32 %v391_v21, %v252_v22 }
 0x157   : > { %v260_v24 = vpack.c.bf16 %v259_v23, %v259_v23 }
 0x159   : > { %406 = vmatmul.mubr.msk.bf16.vlgmr.msra.gmra.mrb[0].mxu0 %vm224_vm0, %v260_v24 }
 0x22c   : > { %v321_v26 = vpop.f32.mrb[0].mxu0 }
 0x22d   : > { %v322_v27 = vadd.f32 %v392_v25, %v321_v26  ;;  %v407_v28 = vpop.f32.mrb[1].mxu0 }
 0x22e   : > { %v324_v29 = vpop.f32.mrb[2].mxu0 }
 0x22f   : > { %v327_v30 = vpack.c.bf16 %v322_v27, %v322_v27  ;;  %v408_v31 = vpop.f32.mrb[3].mxu0 }
 0x231   : > { %329 = vst.msk [vmem:[%s219_s12] sm:$0xf] %vm328_vm4, %v327_v30 }
 0x232 PF: > { %s15_s18 = sadd.s32 1, %s431_s18  }
 0x233   : > { %p12_p4 = scmp.ge.s32.totalorder %s15_s18, 4  }
 0x235   :  { %14 = sbr.rel (!%p12_p4) target bundleno = 1 (0x1), region = 70 }

// kernel: alternating_decoder_forward.19
= control target key start
LH: loop header
LB: loop body
LE: loop exit
PB: predicated region body
PF: predicated region fallthrough
CT: control target
= control target key end

     0   :  { %s358_s12 = smov 0   ;;  %s384_s0 = inlined_call_operand.vmem [shape: f32[16,32], index: 0, kind: input, shape index: {}]   ;;  %s385_s1 = inlined_call_operand.vmem [shape: bf16[32,64], index: 1, kind: input, shape index: {}]   ;;  %s386_s2 = inlined_call_operand.vmem [shape: f32[1,64], index: 2, kind: input, shape index: {}]   ;;  %s387_s3 = inlined_call_operand.vmem [shape: bf16[16,64], index: 3, kind: output, shape index: {}]  }
   0x1 LB: > { %s292_s13 = sadd.s32 4294967295, %s334_s12   ;;  %p296_p0 = scmp.ge.s32.totalorder %s334_s12, 1  ;;  %s334_s12 = sphi %s358_s12, %s13_s12  }
   0x2   : > { %p136_p1 = scmp.lt.s32.totalorder %s334_s12, 3 }
   0x4   : > { %p137_p2 = pnand %p296_p0, %p136_p1 }
   0x5   : > { %v326_v0 = vld [vmem:[%s385_s1] sm:$0xff] (!%p137_p2)   ;;  %v336_v1 = vmov (!%p137_p2), 0.0   ;;  %v327_v2 = vld [vmem:[%s385_s1 + $0x8] sm:$0xff] (!%p137_p2)   ;;  %vm337_vm0 = vmmov (!%p137_p2), 0   ;;  %p158_p3 = scmp.lt.s32.totalorder (!%p137_p2), %s292_s13, 1  ;;  %vm192_vm1 = vcmask (!%p137_p2), 261120  }
   0x6   : > { %140 = sbr.rel (%p137_p2) target bundleno = 236 (0xec), region = 32  ;;  %308 = vmatprep.subr.bf16.mxu0 (!%p137_p2), %v336_v1  ;;  %312 = vmatprep.mubr.msk.bf16.mxu0 (!%p137_p2), %vm337_vm0, %v336_v1  ;;  %v299_v5 = vld [vmem:[%s386_s2] ss:$0 sm:$0xff] (!%p137_p2)  ;;  %vm237_vm2 = vcmask (!%p137_p2), 519168  }
   0x7   : > { %309 = vmatpush3.bf16.msra.mxu0 (!%p137_p2), %v326_v0 }
   0x8   : > { %310 = vmatprep.subr.bf16.mxu0 (!%p137_p2), %v336_v1 }
   0xb   : > { %311 = vmatpush3.bf16.msra.mxu0 (!%p137_p2), %v327_v2 }
   0xd   : > { %s389_s13 = smov (!%p158_p3, %s292_s13), 1 }
   0xe   : > { %s297_s18 = sshll.u32 %s389_s13, 3  ;;  %s298_s24 = sshll.u32 %s389_s13, 2 }
   0xf   : > { %s161_s21 = scalar_lea.vmem %s384_s0, %s297_s18  ;;  %s165_s27 = scalar_lea.vmem %s387_s3, %s298_s24 }
  0x10   : > { %v167_v3 = vld [vmem:[%s161_s21] sm:$0xff] }
  0x11   : > { %v168_v4 = vpack.c.bf16 %v167_v3, %v167_v3 }
  0x13   : > { %313 = vmatmul.mubr.msk.bf16.vlgmr.msra.gmra.mrb[0].mxu0 %vm192_vm1, %v168_v4 }
  0xe6   : > { %v230_v6 = vpop.f32.mrb[0].mxu0 }
  0xe7   : > { %v231_v7 = vadd.f32 %v299_v5, %v230_v6  ;;  %v314_v8 = vpop.f32.mrb[1].mxu0 }
  0xe8   : > { %v233_v9 = vpop.f32.mrb[2].mxu0 }
  0xe9   : > { %v236_v10 = vpack.c.bf16 %v231_v7, %v231_v7  ;;  %v315_v11 = vpop.f32.mrb[3].mxu0 }
  0xeb   : > { %238 = vst.msk [vmem:[%s165_s27] sm:$0xf] %vm237_vm2, %v236_v10 }
  0xec PF: > { %s13_s12 = sadd.s32 1, %s334_s12  }
  0xed   : > { %p10_p4 = scmp.ge.s32.totalorder %s13_s12, 4  }
  0xef   :  { %12 = sbr.rel (!%p10_p4) target bundleno = 1 (0x1), region = 62 }

// kernel: alternating_decoder_forward.23
= control target key start
LH: loop header
LB: loop body
LE: loop exit
PB: predicated region body
PF: predicated region fallthrough
CT: control target
= control target key end

     0   :  { %s465_s18 = smov 0   ;;  %s504_s0 = inlined_call_operand.vmem [shape: f32[16,32], index: 0, kind: input, shape index: {}]   ;;  %s505_s1 = inlined_call_operand.vmem [shape: f32[1,32], index: 1, kind: input, shape index: {}]   ;;  %s506_s2 = inlined_call_operand.vmem [shape: f32[1,32], index: 2, kind: input, shape index: {}]   ;;  %s507_s3 = inlined_call_operand.vmem [shape: bf16[32,64], index: 3, kind: input, shape index: {}]   ;;  %s508_s4 = inlined_call_operand.vmem [shape: f32[1,64], index: 4, kind: input, shape index: {}]   ;;  %s509_s5 = inlined_call_operand.vmem [shape: bf16[16,64], index: 5, kind: output, shape index: {}]  }
   0x1 LB: > { %s383_s19 = sadd.s32 4294967295, %s431_s18   ;;  %p387_p0 = scmp.ge.s32.totalorder %s431_s18, 1  ;;  %s431_s18 = sphi %s465_s18, %s15_s18  }
   0x2   : > { %p186_p1 = scmp.lt.s32.totalorder %s431_s18, 3 }
   0x4   : > { %p187_p2 = pnand %p387_p0, %p186_p1 }
   0x5   : > { %p212_p3 = scmp.lt.s32.totalorder (!%p187_p2), %s383_s19, 1  ;;  %vm224_vm0 = vcmask (!%p187_p2), 261120   ;;  %v419_v7 = vld [vmem:[%s507_s3] sm:$0xff] (!%p187_p2)   ;;  %v433_v8 = vmov (!%p187_p2), 0.0   ;;  %vm434_vm1 = vmmov (!%p187_p2), 0   ;;  %v420_v9 = vld [vmem:[%s507_s3 + $0x8] sm:$0xff] (!%p187_p2)  }
   0x6   : > { %190 = sbr.rel (%p187_p2) target bundleno = 562 (0x232), region = 40  ;;  %401 = vmatprep.subr.bf16.mxu0 (!%p187_p2), %v433_v8  ;;  %405 = vmatprep.mubr.msk.bf16.mxu0 (!%p187_p2), %vm434_vm1, %v433_v8  ;;  %v390_v18 = vld [vmem:[%s505_s1] ss:$0 sm:$0xff] (!%p187_p2)  ;;  %vm328_vm4 = vcmask (!%p187_p2), 519168  }
   0x7   : > { %402 = vmatpush3.bf16.msra.mxu0 (!%p187_p2), %v419_v7  ;;  %v391_v21 = vld [vmem:[%s506_s2] ss:$0 sm:$0xff] (!%p187_p2) }
   0x8   : > { %403 = vmatprep.subr.bf16.mxu0 (!%p187_p2), %v433_v8  ;;  %v392_v25 = vld [vmem:[%s508_s4] ss:$0 sm:$0xff] (!%p187_p2) }
   0xb   : > { %404 = vmatpush3.bf16.msra.mxu0 (!%p187_p2), %v420_v9 }
   0xd   : > { %s511_s19 = smov (!%p212_p3, %s383_s19), 1 }
   0xe   : > { %s388_s20 = sshll.u32 %s511_s19, 3  ;;  %s389_s9 = sshll.u32 %s511_s19, 2 }
   0xf   : > { %s215_s23 = scalar_lea.vmem %s504_s0, %s388_s20  ;;  %s219_s12 = scalar_lea.vmem %s509_s5, %s389_s9 }
  0x10   : > { %v221_v0 = vld [vmem:[%s215_s23] sm:$0xff] }
  0x11   : > { %v225_v1 = vsel %vm224_vm0, %v221_v0, 0.0 }
  0x12   : > { %226 = vadd.xlane.f32.xlu0 %v225_v1 }
  0x9f   : > { %v227_v2 = vpop.xlane.xlu0 %226 }
  0xa0   : > { %v229_v3 = vmul.f32 0.03125, %v227_v2 }
  0xa2   : > { %v230_v4 = vsub.f32 %v221_v0, %v229_v3 }
  0xa4   : > { %v231_v5 = vmul.f32 %v230_v4, %v230_v4  ;;  %v242_v19 = vmul.f32 %v390_v18, %v230_v4 }
  0xa6   : > { %v232_v6 = vsel %vm224_vm0, %v231_v5, 0.0 }
  0xa7   : > { %233 = vadd.xlane.f32.xlu0 %v232_v6 }
 0x134   : > { %v234_v10 = vpop.xlane.xlu0 %233 }
 0x135   : > { %v235_v11 = vmul.f32 0.032258064, %v234_v10 }
 0x137   : > { %421 = vrsqrt.f32 %v235_v11  ;;  %vm245_vm2 = vcmp.eq.f32.partialorder %v235_v11, inf  ;;  %v248_v14 = vand.u32 2147483648, %v235_v11  ;;  %vm247_vm3 = vcmp.eq.f32.partialorder %v235_v11, 0.0 }
 0x141   : > { %v422_v12 = vpop.eup %421 }
 0x142   : > { %v244_v13 = vmul.f32 %v422_v12, %v235_v11 }
 0x144   : > { %v246_v15 = vsel %vm245_vm2, %v235_v11, %v244_v13 }
 0x145   : > { %v249_v16 = vsel %vm247_vm3, %v248_v14, %v246_v15 }
 0x146   : > { %v250_v17 = vadd.f32 1e-06, %v249_v16 }
 0x148   : > { %423 = vrcp.f32 %v250_v17 }
 0x152   : > { %v424_v20 = vpop.eup %423 }
 0x153   : > { %v252_v22 = vmul.f32 %v424_v20, %v242_v19 }
 0x155   : > { %v259_v23 = vadd.f32 %v391_v21, %v252_v22 }
 0x157   : > { %v260_v24 = vpack.c.bf16 %v259_v23, %v259_v23 }
 0x159   : > { %406 = vmatmul.mubr.msk.bf16.vlgmr.msra.gmra.mrb[0].mxu0 %vm224_vm0, %v260_v24 }
 0x22c   : > { %v321_v26 = vpop.f32.mrb[0].mxu0 }
 0x22d   : > { %v322_v27 = vadd.f32 %v392_v25, %v321_v26  ;;  %v407_v28 = vpop.f32.mrb[1].mxu0 }
 0x22e   : > { %v324_v29 = vpop.f32.mrb[2].mxu0 }
 0x22f   : > { %v327_v30 = vpack.c.bf16 %v322_v27, %v322_v27  ;;  %v408_v31 = vpop.f32.mrb[3].mxu0 }
 0x231   : > { %329 = vst.msk [vmem:[%s219_s12] sm:$0xf] %vm328_vm4, %v327_v30 }
 0x232 PF: > { %s15_s18 = sadd.s32 1, %s431_s18  }
 0x233   : > { %p12_p4 = scmp.ge.s32.totalorder %s15_s18, 4  }
 0x235   :  { %14 = sbr.rel (!%p12_p4) target bundleno = 1 (0x1), region = 70 }

// kernel: alternating_decoder_forward.17
= control target key start
LH: loop header
LB: loop body
LE: loop exit
PB: predicated region body
PF: predicated region fallthrough
CT: control target
= control target key end

     0   :  { %s1214_s0 = inlined_call_operand.vmem [shape: s32[2], index: 0, kind: input, shape index: {}]   ;;  %s1215_s1 = inlined_call_operand.vmem [shape: bf16[2,8,32], index: 1, kind: input, shape index: {}]   ;;  %s1216_s2 = inlined_call_operand.vmem [shape: bf16[2,8,64], index: 2, kind: input, shape index: {}]   ;;  %s1217_s3 = inlined_call_operand.vmem [shape: bf16[32,32], index: 3, kind: input, shape index: {}]   ;;  %s1218_s4 = inlined_call_operand.vmem [shape: f32[1,32], index: 4, kind: input, shape index: {}]   ;;  %s1219_s5 = inlined_call_operand.vmem [shape: f32[2,8,32], index: 5, kind: input, shape index: {}]   ;;  %s1220_s6 = inlined_call_operand.vmem [shape: f32[2,8,32], index: 6, kind: output, shape index: {}]  }
   0x1   :  { %s11_s23 = sshll.u32 %s1214_s0, 4  ;;  %s12_s23 = int_to_ptr.vmem [resolvable:$true] %s11_s23 }
   0x2   :  { %s1036_s24 = scalar_lea.vmem %s12_s23, 16  ;;  %p1041_p1 = scmp.lt.s32.totalorder %s12_s23, %s12_s23 }
   0x3   :  { %p1037_p0 = scmp.ne.s32.totalorder %s12_s23, %s1036_s24  ;;  %p1042_p2 = scmp.lt.s32.totalorder %s1036_s24, %s1036_s24 }
   0x5   :  { %p1043_p3 = por %p1042_p2, %p1041_p1 }
   0x7   :  { %p1044_p4 = pnand %p1043_p3, %p1037_p0 }
   0x9   :  { %1047 = shalt.err (!%p1044_p4)  }
   0xa   :  { %s1058_s25 = smov [#allocation4]  }
   0xb   :  { %14 = dma.vmem_to_smem %s12_s23, 16, %s1058_s25, [#allocation3] }
   0xc   :  { %1052 = dma.done.wait [#allocation3], 16 }
   0xd   :  { %1053 = vsyncadd [#allocation3], 4294967280 }
   0xe   :  { %16 = sfence }
   0xf   :  { %s1110_s26 = smov 0  }
  0x10 LB: > { %s894_s0 = sadd.s32 4294967295, %s1056_s26   ;;  %p898_p5 = scmp.ge.s32.totalorder %s1056_s26, 1  ;;  %s1056_s26 = sphi %s1110_s26, %s22_s26  }
  0x11   : > { %p211_p6 = scmp.lt.s32.totalorder %s1056_s26, 3 }
  0x13   : > { %p212_p7 = pnand %p898_p5, %p211_p6 }
  0x14   : > { %p245_p8 = scmp.lt.s32.totalorder (!%p212_p7), %s894_s0, 1  ;;  %v1059_v0 = vmov (!%p212_p7), 0.0   ;;  %vm1060_vm0 = vmmov (!%p212_p7), 0   ;;  %vm274_vm1 = vcmask (!%p212_p7), 64512   ;;  %s262_s11 = sld [smem:[#allocation4 + %s894_s0]] (!%p212_p7)  ;;  %v265_v4 = vlaneseq (!%p212_p7) }
  0x15   : > { %215 = sbr.rel (%p212_p7) target bundleno = 1684 (0x694), region = 40  ;;  %938 = vmatprep.subr.bf16.mxu0 (!%p212_p7), %v1059_v0  ;;  %940 = vmatprep.mubr.msk.bf16.mxu0 (!%p212_p7), %vm1060_vm0, %v1059_v0  ;;  %v1061_v9 = vmov (!%p212_p7), -1e+09   ;;  %s1062_s12 = smov (!%p212_p7), 96   ;;  %vm343_vm5 = vcmask (!%p212_p7), 1043456   ;;  %vm507_vm6 = vcmask (!%p212_p7), 130112  }
  0x16   : > { %944 = vmatprep.subr.bf16.mxu1 (!%p212_p7), %v1059_v0  ;;  %946 = vmatprep.mubr.msk.bf16.mxu1 (!%p212_p7), %vm1060_vm0, %v1059_v0  ;;  %v266_v5 = vshrl.u32 (!%p212_p7), %v265_v4, 7  ;;  %v268_v6 = vand.u32 (!%p212_p7), 127, %v265_v4  ;;  %s1063_s13 = smov (!%p212_p7), 120   ;;  %s1064_s14 = smov (!%p212_p7), 112   ;;  %vm625_vm7 = vcmask (!%p212_p7), 195712   ;;  %vm743_vm8 = vcmask (!%p212_p7), 261312  }
  0x17   : > { %s1065_s15 = smov (!%p212_p7), 104   ;;  %s1066_s16 = smov (!%p212_p7), 88   ;;  %vm770_vm9 = vcmask (!%p212_p7), 261120  }
  0x18   : > { %vm269_vm2 = vcmp.le.s32.totalorder (!%p212_p7), %v268_v6, %v266_v5  ;;  %s1067_s17 = smov (!%p212_p7), 72   ;;  %s1068_s18 = smov (!%p212_p7), 80  }
  0x19   : > { %s1069_s19 = smov (!%p212_p7), 8   ;;  %s1070_s24 = smov (!%p212_p7), 16  }
  0x1a   : > { %v270_v7 = vstv (!%p212_p7), %s262_s11  ;;  %s1071_s25 = smov (!%p212_p7), 24  }
  0x1b   : > { %vm271_vm3 = vcmp.lt.s32.totalorder (!%p212_p7), %v266_v5, %v270_v7 }
  0x1c   : > { %s1121_s27 = scalar_select %p245_p8, %s894_s0, 1  ;;  %vm272_vm4 = vmand %vm269_vm2, %vm271_vm3 }
  0x1d   : > { %v1138_v10 = vsel %vm272_vm4, 0.0, %v1061_v9 }
  0x1e   : > { %s899_s28 = sshll.u32 %s1121_s27, 2  ;;  %s901_s0 = sshll.u32 %s1121_s27, 3 }
  0x1f   : > { %s252_s7 = scalar_lea.vmem %s1216_s2, %s899_s28  ;;  %s248_s10 = scalar_lea.vmem %s1215_s1, %s899_s28 }
  0x20   : > { %v264_v1 = vld [vmem:[%s252_s7] sm:$0xf]  ;;  %s256_s30 = scalar_lea.vmem %s1219_s5, %s901_s0  ;;  %s260_s11 = scalar_lea.vmem %s1220_s6, %s901_s0 }
  0x21   : > { %v279_v2 = vsel %vm274_vm1, %v264_v1, 0  ;;  %v263_v3 = vld [vmem:[%s248_s10] sm:$0xf]  ;;  %v1142_v17 = vcombine.low %v264_v1, %v264_v1 }
  0x22   : > { %939 = vmatpush3.bf16.xpose.msra.mxu0 %v279_v2  ;;  %v906_v18 = vcombine.low %v263_v3, %v263_v3 }
  0x23   : > { %956 = vmatprep.subr.bf16.mxu0 %v1059_v0  ;;  %338 = vrot.lane.b32.xlu1 %v1142_v17, %s1062_s12 }
  0x27   : > { %393 = vrot.lane.b32.xlu1 %v1142_v17, %s1063_s13 }
  0x29   : > { %941 = vmatmul.mubr.msk.bf16.vlgmr.msra.gmra.mrb[0].mxu0 %vm274_vm1, %v263_v3 }
  0x2a   : > { %958 = vmatprep.mubr.msk.bf16.mxu0 %vm1060_vm0, %v1059_v0 }
  0x2b   : > { %511 = vrot.lane.b32.xlu1 %v1142_v17, %s1064_s14 }
  0x2f   : > { %509 = vrot.lane.b32.xlu1 %v906_v18, %s1064_s14 }
  0x33   : > { %629 = vrot.lane.b32.xlu1 %v1142_v17, %s1065_s15 }
  0x37   : > { %627 = vrot.lane.b32.xlu1 %v906_v18, %s1065_s15 }
  0x95   : > { %v339_v24 = vpop.permute.xlu1 %338 }
  0x96   : > { %v345_v25 = vsel %vm343_vm5, %v339_v24, 0 }
  0x97   : > { %945 = vmatpush3.bf16.msra.mxu1 %v345_v25 }
  0x98   : > { %950 = vmatprep.subr.bf16.mxu1 %v1059_v0 }
  0x99   : > { %v394_v28 = vpop.permute.xlu1 %393 }
  0x9a   : > { %v399_v30 = vsel %vm274_vm1, %v394_v28, 0 }
  0x9d   : > { %v512_v32 = vpop.permute.xlu1 %511 }
  0x9e   : > { %v517_v35 = vsel %vm274_vm1, %v512_v32, 0 }
  0xa1   : > { %v510_v34 = vpop.permute.xlu1 %509 }
  0xa5   : > { %v630_v36 = vpop.permute.xlu1 %629 }
  0xa6   : > { %v635_v37 = vsel %vm274_vm1, %v630_v36, 0 }
  0xa9   : > { %v628_v38 = vpop.permute.xlu1 %627 }
  0xfc   : > { %v315_v8 = vpop.f32.mrb[0].mxu0 }
  0xfd   : > { %v321_v11 = vmul.f32 0.35355338, %v315_v8  ;;  %v942_v12 = vpop.f32.mrb[1].mxu0 }
  0xfe   : > { %v318_v13 = vpop.f32.mrb[2].mxu0 }
  0xff   : > { %v943_v14 = vpop.f32.mrb[3].mxu0  ;;  %v322_v15 = vadd.f32 %v321_v11, %v1138_v10 }
 0x101   : > { %v323_v16 = vsel %vm274_vm1, %v322_v15, -inf }
 0x102   : > { %324 = vmax.xlane.f32.xlu0 %v323_v16 }
 0x18f   : > { %v325_v19 = vpop.xlane.xlu0 %324 }
 0x190   : > { %v326_v20 = vsub.f32 %v322_v15, %v325_v19 }
 0x192   : > { %v327_v21 = vmul.f32 1.442695, %v326_v20 }
 0x194   : > { %1020 = vpow2.f32 %v327_v21 }
 0x19e   : > { %v1021_v22 = vpop.eup %1020 }
 0x19f   : > { %v329_v23 = vsel %vm274_vm1, %v1021_v22, 0.0 }
 0x1a0   : > { %330 = vadd.xlane.f32.xlu0 %v329_v23 }
 0x1b6   : > { %391 = vrot.lane.b32.xlu0 %v906_v18, %s1063_s13 }
 0x22d   : > { %v331_v26 = vpop.xlane.xlu0 %330 }
 0x22e   : > { %1022 = vrcp.f32 %v331_v26 }
 0x231   : > { %v392_v33 = vpop.permute.xlu0 %391 }
 0x238   : > { %v1023_v27 = vpop.eup %1022 }
 0x239   : > { %v333_v29 = vmul.f32 %v1023_v27, %v1021_v22 }
 0x23b   : > { %v334_v31 = vpack.c.bf16 %v333_v29, %v333_v29 }
 0x23d   : > { %947 = vmatmul.mubr.msk.bf16.vlgmr.msra.gmra.mrb[0].mxu1 %vm274_vm1, %v334_v31 }
 0x23e   : > { %951 = vmatpush3.bf16.xpose.msra.mxu1 %v399_v30  ;;  %952 = vmatprep.mubr.msk.bf16.mxu1 %vm1060_vm0, %v1059_v0 }
 0x23f   : > { %962 = vmatprep.subr.bf16.mxu1 %v1059_v0 }
 0x245   : > { %953 = vmatmul.mubr.msk.bf16.vlgmr.msra.gmra.mrb[4].mxu1 %vm274_vm1, %v392_v33 }
 0x246   : > { %963 = vmatpush3.bf16.xpose.msra.mxu1 %v517_v35  ;;  %964 = vmatprep.mubr.msk.bf16.mxu1 %vm1060_vm0, %v1059_v0 }
 0x247   : > { %974 = vmatprep.subr.bf16.mxu1 %v1059_v0 }
 0x24d   : > { %965 = vmatmul.mubr.msk.bf16.vlgmr.msra.gmra.mrb[8].mxu1 %vm274_vm1, %v510_v34 }
 0x24e   : > { %975 = vmatpush3.bf16.xpose.msra.mxu1 %v635_v37  ;;  %976 = vmatprep.mubr.msk.bf16.mxu1 %vm1060_vm0, %v1059_v0 }
 0x24f   : > { %986 = vmatprep.subr.bf16.mxu1 %v1059_v0 }
 0x255   : > { %977 = vmatmul.mubr.msk.bf16.vlgmr.msra.gmra.mrb[12].mxu1 %vm274_vm1, %v628_v38  ;;  %v1018_v38 = vld [vmem:[%s1217_s3] sm:$0xff]  }
 0x256   : > { %990 = vmatprep.mubr.msk.bf16.mxu1 %vm1060_vm0, %v1059_v0  ;;  %987 = vmatpush3.bf16.msra.mxu1 %v1018_v38 }
 0x257   : > { %988 = vmatprep.subr.bf16.mxu1 %v1059_v0 }
 0x310   : > { %v381_v39 = vpop.f32.mrb[0].mxu1 }
 0x311   : > { %387 = vst.msk [vmem:[#allocation2] sm:$0xff] %vm274_vm1, %v381_v39  ;;  %v948_v40 = vpop.f32.mrb[1].mxu1  ;;  %v1019_v39 = vld [vmem:[%s1217_s3 + $0x8] sm:$0xff]  }
 0x312   : > { %v384_v41 = vpop.f32.mrb[2].mxu1  ;;  %989 = vmatpush3.bf16.msra.mxu1 %v1019_v39 }
 0x313   : > { %v949_v42 = vpop.f32.mrb[3].mxu1 }
 0x318   : > { %v435_v43 = vpop.f32.mrb[4].mxu1 }
 0x319   : > { %v441_v44 = vmul.f32 0.35355338, %v435_v43  ;;  %v954_v45 = vpop.f32.mrb[5].mxu1 }
 0x31a   : > { %v438_v46 = vpop.f32.mrb[6].mxu1 }
 0x31b   : > { %v955_v47 = vpop.f32.mrb[7].mxu1  ;;  %v442_v48 = vadd.f32 %v441_v44, %v1138_v10 }
 0x31d   : > { %v443_v49 = vsel %vm274_vm1, %v442_v48, -inf }
 0x31e   : > { %444 = vmax.xlane.f32.xlu1 %v443_v49 }
 0x320   : > { %v553_v50 = vpop.f32.mrb[8].mxu1 }
 0x321   : > { %v559_v51 = vmul.f32 0.35355338, %v553_v50  ;;  %v966_v52 = vpop.f32.mrb[9].mxu1 }
 0x322   : > { %v556_v53 = vpop.f32.mrb[10].mxu1  ;;  %v913_v52 = vld [vmem:[%s1218_s4] ss:$0 sm:$0xff] }
 0x323   : > { %v967_v54 = vpop.f32.mrb[11].mxu1  ;;  %v560_v55 = vadd.f32 %v559_v51, %v1138_v10 }
 0x324   : > { %v814_v54 = vld [vmem:[%s256_s30] sm:$0xff] }
 0x325   : > { %v561_v56 = vsel %vm274_vm1, %v560_v55, -inf }
 0x326   : > { %562 = vmax.xlane.f32.xlu0 %v561_v56 }
 0x328   : > { %v671_v57 = vpop.f32.mrb[12].mxu1 }
 0x329   : > { %v677_v58 = vmul.f32 0.35355338, %v671_v57  ;;  %v978_v59 = vpop.f32.mrb[13].mxu1 }
 0x32a   : > { %v674_v60 = vpop.f32.mrb[14].mxu1 }
 0x32b   : > { %v979_v61 = vpop.f32.mrb[15].mxu1  ;;  %v678_v62 = vadd.f32 %v677_v58, %v1138_v10 }
 0x32d   : > { %v679_v63 = vsel %vm274_vm1, %v678_v62, -inf }
 0x32e   : > { %680 = vmax.xlane.f32.xlu1 %v679_v63 }
 0x33f   : > { %455 = vrot.lane.b32.xlu1 %v1142_v17, %s1066_s16 }
 0x3ab   : > { %v445_v1 = vpop.xlane.xlu1 %444 }
 0x3ac   : > { %v446_v2 = vsub.f32 %v442_v48, %v445_v1 }
 0x3ae   : > { %v447_v3 = vmul.f32 1.442695, %v446_v2 }
 0x3b0   : > { %1024 = vpow2.f32 %v447_v3 }
 0x3b3   : > { %v563_v4 = vpop.xlane.xlu0 %562 }
 0x3b4   : > { %v564_v5 = vsub.f32 %v560_v55, %v563_v4 }
 0x3b6   : > { %v565_v6 = vmul.f32 1.442695, %v564_v5 }
 0x3b8   : > { %1026 = vpow2.f32 %v565_v6 }
 0x3ba   : > { %v1025_v7 = vpop.eup %1024 }
 0x3bb   : > { %v681_v8 = vpop.xlane.xlu1 %680  ;;  %v449_v9 = vsel %vm274_vm1, %v1025_v7, 0.0 }
 0x3bc   : > { %v682_v11 = vsub.f32 %v678_v62, %v681_v8  ;;  %450 = vadd.xlane.f32.xlu0 %v449_v9 }
 0x3be   : > { %v683_v10 = vmul.f32 1.442695, %v682_v11 }
 0x3bf   : > { %v456_v12 = vpop.permute.xlu1 %455 }
 0x3c0   : > { %1028 = vpow2.f32 %v683_v10  ;;  %v461_v13 = vsel %vm343_vm5, %v456_v12, 0 }
 0x3c1   : > { %957 = vmatpush3.bf16.msra.mxu0 %v461_v13 }
 0x3c2   : > { %v1027_v14 = vpop.eup %1026  ;;  %968 = vmatprep.subr.bf16.mxu0 %v1059_v0 }
 0x3c3   : > { %v567_v15 = vsel %vm274_vm1, %v1027_v14, 0.0 }
 0x3c4   : > { %568 = vadd.xlane.f32.xlu1 %v567_v15 }
 0x3ca   : > { %v1029_v16 = vpop.eup %1028 }
 0x3cb   : > { %v685_v18 = vsel %vm274_vm1, %v1029_v16, 0.0 }
 0x3cc   : > { %686 = vadd.xlane.f32.xlu0 %v685_v18 }
 0x3d5   : > { %691 = vrot.lane.b32.xlu1 %v1142_v17, %s1067_s17 }
 0x3e2   : > { %573 = vrot.lane.b32.xlu0 %v1142_v17, %s1068_s18 }
 0x449   : > { %v451_v19 = vpop.xlane.xlu0 %450 }
 0x44a   : > { %1030 = vrcp.f32 %v451_v19 }
 0x451   : > { %v569_v20 = vpop.xlane.xlu1 %568 }
 0x452   : > { %1032 = vrcp.f32 %v569_v20 }
 0x454   : > { %v1031_v21 = vpop.eup %1030 }
 0x455   : > { %v453_v22 = vmul.f32 %v1031_v21, %v1025_v7  ;;  %v692_v28 = vpop.permute.xlu1 %691 }
 0x456   : > { %v697_v30 = vsel %vm343_vm5, %v692_v28, 0 }
 0x457   : > { %v454_v23 = vpack.c.bf16 %v453_v22, %v453_v22 }
 0x459   : > { %v687_v24 = vpop.xlane.xlu0 %686  ;;  %959 = vmatmul.mubr.msk.bf16.vlgmr.msra.gmra.mrb[4].mxu0 %vm274_vm1, %v454_v23 }
 0x45a   : > { %1034 = vrcp.f32 %v687_v24  ;;  %970 = vmatprep.mubr.msk.bf16.mxu0 %vm1060_vm0, %v1059_v0 }
 0x45c   : > { %v1033_v25 = vpop.eup %1032 }
 0x45d   : > { %v571_v26 = vmul.f32 %v1033_v25, %v1027_v14  ;;  %v574_v27 = vpop.permute.xlu0 %573 }
 0x45e   : > { %v579_v17 = vsel %vm343_vm5, %v574_v27, 0 }
 0x45f   : > { %969 = vmatpush3.bf16.msra.mxu0 %v579_v17  ;;  %v572_v29 = vpack.c.bf16 %v571_v26, %v571_v26 }
 0x460   : > { %980 = vmatprep.subr.bf16.mxu0 %v1059_v0 }
 0x462   : > { %971 = vmatmul.mubr.msk.bf16.vlgmr.msra.gmra.mrb[8].mxu0 %vm274_vm1, %v572_v29 }
 0x463   : > { %981 = vmatpush3.bf16.msra.mxu0 %v697_v30  ;;  %982 = vmatprep.mubr.msk.bf16.mxu0 %vm1060_vm0, %v1059_v0 }
 0x464   : > { %v1035_v31 = vpop.eup %1034 }
 0x465   : > { %v689_v32 = vmul.f32 %v1035_v31, %v1029_v16 }
 0x467   : > { %v690_v33 = vpack.c.bf16 %v689_v32, %v689_v32 }
 0x46a   : > { %983 = vmatmul.mubr.msk.bf16.vlgmr.msra.gmra.mrb[12].mxu0 %vm274_vm1, %v690_v33 }
 0x52c   : > { %v497_v34 = vpop.f32.mrb[4].mxu0 }
 0x52d   : > { %504 = vrot.lane.b32.xlu1 %v497_v34, %s1069_s19  ;;  %v960_v35 = vpop.f32.mrb[5].mxu0 }
 0x52e   : > { %v500_v36 = vpop.f32.mrb[6].mxu0 }
 0x52f   : > { %v961_v37 = vpop.f32.mrb[7].mxu0 }
 0x535   : > { %v615_v40 = vpop.f32.mrb[8].mxu0 }
 0x536   : > { %622 = vrot.lane.b32.xlu0 %v615_v40, %s1070_s24  ;;  %v972_v41 = vpop.f32.mrb[9].mxu0 }
 0x537   : > { %v618_v42 = vpop.f32.mrb[10].mxu0 }
 0x538   : > { %v973_v43 = vpop.f32.mrb[11].mxu0 }
 0x53d   : > { %v733_v44 = vpop.f32.mrb[12].mxu0 }
 0x53e   : > { %740 = vrot.lane.b32.xlu1 %v733_v44, %s1071_s25  ;;  %v984_v45 = vpop.f32.mrb[13].mxu0 }
 0x53f   : > { %v736_v46 = vpop.f32.mrb[14].mxu0 }
 0x540   : > { %v985_v47 = vpop.f32.mrb[15].mxu0 }
 0x59f   : > { %v505_v48 = vpop.permute.xlu1 %504 }
 0x5a0   : > { %508 = vst.msk [vmem:[#allocation2] sm:$0xff] %vm507_vm6, %v505_v48 }
 0x5a8   : > { %v623_v49 = vpop.permute.xlu0 %622 }
 0x5a9   : > { %626 = vst.msk [vmem:[#allocation2] sm:$0xff] %vm625_vm7, %v623_v49 }
 0x5b0   : > { %v741_v0 = vpop.permute.xlu1 %740 }
 0x5b1   : > { %744 = vst.msk [vmem:[#allocation2] sm:$0xff] %vm743_vm8, %v741_v0 }
 0x5b8   : > { %v745_v50 = vld [vmem:[#allocation2] sm:$0xff] }
 0x5b9   : > { %v746_v51 = vpack.c.bf16 %v745_v50, %v745_v50 }
 0x5bb   : > { %991 = vmatmul.mubr.msk.bf16.vlgmr.msra.gmra.mrb[16].mxu1 %vm770_vm9, %v746_v51 }
 0x68e   : > { %v808_v53 = vpop.f32.mrb[16].mxu1 }
 0x68f   : > { %v809_v55 = vadd.f32 %v913_v52, %v808_v53  ;;  %v992_v56 = vpop.f32.mrb[17].mxu1 }
 0x690   : > { %v811_v57 = vpop.f32.mrb[18].mxu1 }
 0x691   : > { %v815_v58 = vadd.f32 %v814_v54, %v809_v55  ;;  %v993_v59 = vpop.f32.mrb[19].mxu1 }
 0x693   : > { %816 = vst.msk [vmem:[%s260_s11] sm:$0xff] %vm770_vm9, %v815_v58 }
 0x694 PF: > { %s22_s26 = sadd.s32 1, %s1056_s26  }
 0x695   : > { %p19_p9 = scmp.ge.s32.totalorder %s22_s26, 4  }
 0x697   :  { %21 = sbr.rel (!%p19_p9) target bundleno = 16 (0x10), region = 76 }

// kernel: alternating_decoder_forward.29
= control target key start
LH: loop header
LB: loop body
LE: loop exit
PB: predicated region body
PF: predicated region fallthrough
CT: control target
= control target key end

     0   :  { %8 = vsyncpa [#allocation3], 0  ;;  %s528_s0 = inlined_call_operand.vmem [shape: f32[16,32], index: 0, kind: input, shape index: {}]   ;;  %s529_s1 = inlined_call_operand.vmem [shape: f32[1,32], index: 1, kind: input, shape index: {}]   ;;  %s530_s2 = inlined_call_operand.vmem [shape: f32[1,32], index: 2, kind: input, shape index: {}]   ;;  %s531_s3 = inlined_call_operand.hbm [shape: f32[16,32], index: 3, kind: output, shape index: {}]  }
   0x1   :  { %10 = vsyncpa [#allocation3 + $0x1], 0  ;;  %s419_s12 = smov 0   ;;  %s421_s13 = smov 0  }
   0x2   :  { %s423_s14 = smov 0   ;;  %s425_s15 = smov 0  }
   0x3 LB: > { %s440_s16 = sadd.s32 4294967295, %s396_s15   ;;  %s279_s17 = sadd.s32 4294967294, %s396_s15   ;;  %s396_s15 = sphi %s425_s15, %s537_s15   ;;  %s392_s14 = sphi %s423_s14, %s536_s14   ;;  %s388_s13 = sphi %s421_s13, %s535_s13   ;;  %s384_s12 = sphi %s419_s12, %s534_s12  }
   0x4   : > { %s444_s18 = sadd.s32 1, %s396_s15   ;;  %s91_s19 = sadd.s32 1, %s392_s14 }
   0x5   : > { %s88_s20 = ssub.s32 %s396_s15, %s444_s18  ;;  %p101_p0 = scmp.ne.s32.totalorder %s392_s14, %s388_s13 }
   0x6   : > { %p89_p1 = scmp.eq.s32.totalorder %s88_s20, 0  ;;  %p102_p2 = scmp.eq.s32.totalorder %s440_s16, 1 }
   0x7   : > { %p107_p3 = scmp.ne.s32.totalorder %s388_s13, %s384_s12  ;;  %p108_p4 = scmp.eq.s32.totalorder %s279_s17, 1 }
   0x8   : > { %s455_s21 = scalar_select %p89_p1, %s392_s14, %s91_s19  }
   0x9   : > { %p457_p5 = por %p102_p2, %p101_p0  ;;  %p461_p6 = por %p108_p4, %p107_p3 }
   0xa   : > { %p282_p7 = scmp.ge.s32.totalorder %s396_s15, 1  ;;  %p139_p8 = scmp.lt.s32.totalorder %s396_s15, 3 }
   0xc   : > { %p140_p9 = pnand %p282_p7, %p139_p8 }
   0xd   : > { %p162_p10 = scmp.lt.s32.totalorder (!%p140_p9), %s440_s16, 1  ;;  %vm169_vm0 = vcmask (!%p140_p9), 261120   ;;  %s159_s29 = sand.u32 (!%p140_p9), 1, %s388_s13   ;;  %v285_v15 = vld [vmem:[%s529_s1] ss:$0 sm:$0xff] (!%p140_p9) }
   0xe   : > { %143 = sbr.rel (%p140_p9) target bundleno = 366 (0x16e), region = 32  ;;  %s283_s30 = sshll.u32 (!%p140_p9), %s159_s29, 3  ;;  %v286_v18 = vld [vmem:[%s530_s2] ss:$0 sm:$0xff] (!%p140_p9) }
   0xf   : > { %s288_s8 = sshll.u32 (!%p140_p9), %s440_s16, 7  ;;  %s161_s9 = scalar_lea.vmem (!%p140_p9), [#allocation2], %s283_s30 }
  0x10   : > { %s220_s10 = sshll.u32 (!%p140_p9), %s161_s9, 4  ;;  %s485_s19 = scalar_lea.hbm (!%p140_p9), %s531_s3, %s288_s8  ;;  %s487_s10 = int_to_ptr.vmem [resolvable:$true] %s220_s10 }
  0x11   : > { %s207_s20 = scalar_lea.sflag (!%p140_p9), [#allocation3], %s159_s29 }
  0x15   : > { %s163_s24 = scalar_select %p162_p10, %s440_s16, 1 }
  0x16   : > { %s398_s16 = smov [#allocation2]  }
  0x17   : > { %s284_s25 = sshll.u32 %s163_s24, 3  ;;  %s334_s24 = scalar_lea.vmem %s487_s10, 128 }
  0x18   : > { %s165_s28 = scalar_lea.vmem %s528_s0, %s284_s25  ;;  %p335_p11 = scmp.ne.s32.totalorder %s487_s10, %s334_s24 }
  0x19   : > { %v166_v0 = vld [vmem:[%s165_s28] sm:$0xff]  ;;  %s338_s25 = sshll.u32 %s398_s16, 4  ;;  %s339_s25 = int_to_ptr.vmem [resolvable:$false] %s338_s25 }
  0x1a   : > { %v170_v1 = vsel %vm169_vm0, %v166_v0, 0.0  ;;  %p336_p12 = pnand %p335_p11, %p457_p5  ;;  %s340_s26 = scalar_lea.vmem %s339_s25, 256 }
  0x1b   : > { %171 = vadd.xlane.f32.xlu0 %v170_v1  ;;  %p341_p0 = scmp.lt.s32.totalorder %s487_s10, %s339_s25  ;;  %p342_p1 = scmp.lt.s32.totalorder %s340_s26, %s334_s24 }
  0x1c   : > { %p337_p13 = pneg %p336_p12 }
  0x1d   : > { %p343_p2 = por %p342_p1, %p341_p0 }
  0x1f   : > { %p344_p3 = pnand %p343_p2, %p337_p13 }
  0xa8   : > { %v172_v2 = vpop.xlane.xlu0 %171 }
  0xa9   : > { %v174_v3 = vmul.f32 0.03125, %v172_v2 }
  0xab   : > { %v175_v4 = vsub.f32 %v166_v0, %v174_v3 }
  0xad   : > { %v176_v5 = vmul.f32 %v175_v4, %v175_v4  ;;  %v187_v16 = vmul.f32 %v285_v15, %v175_v4 }
  0xaf   : > { %v177_v6 = vsel %vm169_vm0, %v176_v5, 0.0 }
  0xb0   : > { %178 = vadd.xlane.f32.xlu0 %v177_v6 }
 0x13d   : > { %v179_v7 = vpop.xlane.xlu0 %178 }
 0x13e   : > { %v180_v8 = vmul.f32 0.032258064, %v179_v7 }
 0x140   : > { %330 = vrsqrt.f32 %v180_v8  ;;  %vm190_vm1 = vcmp.eq.f32.partialorder %v180_v8, inf  ;;  %v193_v11 = vand.u32 2147483648, %v180_v8  ;;  %vm192_vm2 = vcmp.eq.f32.partialorder %v180_v8, 0.0 }
 0x14a   : > { %v331_v9 = vpop.eup %330 }
 0x14b   : > { %v189_v10 = vmul.f32 %v331_v9, %v180_v8 }
 0x14d   : > { %v191_v12 = vsel %vm190_vm1, %v180_v8, %v189_v10 }
 0x14e   : > { %v194_v13 = vsel %vm192_vm2, %v193_v11, %v191_v12 }
 0x14f   : > { %v195_v14 = vadd.f32 1e-06, %v194_v13 }
 0x151   : > { %332 = vrcp.f32 %v195_v14 }
 0x15b   : > { %v333_v17 = vpop.eup %332 }
 0x15c   : > { %v197_v19 = vmul.f32 %v333_v17, %v187_v16 }
 0x15e   : > { %v204_v20 = vadd.f32 %v286_v18, %v197_v19 }
 0x160   : > { %205 = vst.msk [vmem:[%s161_s9] sm:$0xff] %vm169_vm0, %v204_v20 }
 0x161   : > { %347 = shalt.err (!%p344_p3)
}
 0x162   : > { %s348_s27 = scalar_lea.hbm %s485_s19, 128  ;;  %s352_s30 = scalar_lea.hbm %s531_s3, 256 }
 0x163   : > { %p349_p4 = scmp.ne.s32.totalorder %s485_s19, %s348_s27  ;;  %p353_p9 = scmp.lt.u32.totalorder %s485_s19, %s531_s3 }
 0x164   : > { %p354_p10 = scmp.lt.u32.totalorder %s352_s30, %s348_s27  ;;  %p356_p12 = scmp.lt.u32.totalorder %s348_s27, %s485_s19 }
 0x165   : > { %p350_p7 = pnand %p349_p4, %p457_p5 }
 0x166   : > { %p355_p11 = por %p354_p10, %p353_p9 }
 0x167   : > { %p351_p8 = pneg %p350_p7 }
 0x168   : > { %p357_p13 = por %p356_p12, %p355_p11 }
 0x16a   : > { %p358_p0 = pnand %p357_p13, %p351_p8 }
 0x16c   : > { %361 = shalt.err (!%p358_p0)
}
 0x16d   : > { %291 = dma.vmem_to_hbm [thread:$0]  (%p457_p5), %s487_s10, 128, %s485_s19, %s207_s20  }
 0x16e PF: > { %p297_p1 = scmp.ge.s32.totalorder %s396_s15, 2  ;;  %s232_s6 = sand.u32 1, %s384_s12  }
 0x16f   : > { %s233_s7 = scalar_lea.sflag [#allocation3], %s232_s6 }
 0x170   : > { %p294_p2 = pnand %p297_p1, %p461_p6 }
 0x172   : > { %379 = dma.done.wait (!%p294_p2), %s233_s7, 128  }
 0x173   : > { %381 = vsyncadd (!%p294_p2), %s233_s7, 4294967168  ;;  %p13_p3 = scmp.ge.s32.totalorder %s444_s18, 4   ;;  %s534_s12 = smov %s388_s13 }
 0x174   : > { %s535_s13 = smov %s392_s14  ;;  %s536_s14 = smov %s455_s21 }
 0x175   : > { %s537_s15 = smov %s444_s18  ;;  %15 = sbr.rel (!%p13_p3) target bundleno = 3 (0x3), region = 67 }
 0x17c   :  { %238 = vsyncpa [#allocation3], 1 }
 0x17d   :  { %240 = vsyncpa [#allocation3 + $0x1], 1 }

// kernel: alternating_decoder_forward.20
= control target key start
LH: loop header
LB: loop body
LE: loop exit
PB: predicated region body
PF: predicated region fallthrough
CT: control target
= control target key end

     0   :  { %s1130_s21 = smov 0   ;;  %s1238_s0 = inlined_call_operand.vmem [shape: bf16[2,8,32], index: 0, kind: input, shape index: {}]   ;;  %s1239_s1 = inlined_call_operand.vmem [shape: bf16[2,8,64], index: 1, kind: input, shape index: {}]   ;;  %s1240_s2 = inlined_call_operand.vmem [shape: f32[2,1,8], index: 2, kind: input, shape index: {}]   ;;  %s1241_s3 = inlined_call_operand.vmem [shape: bf16[32,32], index: 3, kind: input, shape index: {}]   ;;  %s1242_s4 = inlined_call_operand.vmem [shape: f32[1,32], index: 4, kind: input, shape index: {}]   ;;  %s1243_s5 = inlined_call_operand.vmem [shape: f32[2,8,32], index: 5, kind: input, shape index: {}]   ;;  %s1244_s6 = inlined_call_operand.vmem [shape: f32[2,8,32], index: 6, kind: output, shape index: {}]  }
   0x1 LB: > { %s934_s22 = sadd.s32 4294967295, %s1081_s21   ;;  %p938_p0 = scmp.ge.s32.totalorder %s1081_s21, 1  ;;  %s1081_s21 = sphi %s1130_s21, %s16_s21  }
   0x2   : > { %p237_p1 = scmp.lt.s32.totalorder %s1081_s21, 3 }
   0x4   : > { %p238_p2 = pnand %p938_p0, %p237_p1 }
   0x5   : > { %p276_p3 = scmp.lt.s32.totalorder (!%p238_p2), %s934_s22, 1  ;;  %v1083_v0 = vmov (!%p238_p2), 0.0   ;;  %vm1084_vm0 = vmmov (!%p238_p2), 0   ;;  %vm299_vm1 = vcmask (!%p238_p2), 64512   ;;  %s1085_s9 = smov (!%p238_p2), 96   ;;  %vm374_vm2 = vcmask (!%p238_p2), 1043456  }
   0x6   : > { %241 = sbr.rel (%p238_p2) target bundleno = 1668 (0x684), region = 44  ;;  %979 = vmatprep.subr.bf16.mxu0 (!%p238_p2), %v1083_v0  ;;  %981 = vmatprep.mubr.msk.bf16.mxu0 (!%p238_p2), %vm1084_vm0, %v1083_v0  ;;  %s1086_s10 = smov (!%p238_p2), 120   ;;  %vm538_vm3 = vcmask (!%p238_p2), 130112   ;;  %vm656_vm4 = vcmask (!%p238_p2), 195712   ;;  %vm774_vm5 = vcmask (!%p238_p2), 261312   ;;  %vm801_vm6 = vcmask (!%p238_p2), 261120  }
   0x7   : > { %985 = vmatprep.subr.bf16.mxu1 (!%p238_p2), %v1083_v0  ;;  %987 = vmatprep.mubr.msk.bf16.mxu1 (!%p238_p2), %vm1084_vm0, %v1083_v0  ;;  %s1087_s11 = smov (!%p238_p2), 112   ;;  %s1088_s12 = smov (!%p238_p2), 104  }
   0x8   : > { %s1089_s13 = smov (!%p238_p2), 88   ;;  %s1090_s14 = smov (!%p238_p2), 72  }
   0x9   : > { %s1091_s15 = smov (!%p238_p2), 80   ;;  %s1092_s16 = smov (!%p238_p2), 8  }
   0xa   : > { %s1094_s24 = smov (!%p238_p2), 24  }
   0xd   : > { %s1246_s22 = smov (!%p276_p3, %s934_s22), 1 }
   0xe   : > { %s939_s23 = sshll.u32 %s1246_s22, 2  ;;  %s286_s8 = scalar_lea.vmem %s1240_s2, %s1246_s22 }
   0xf   : > { %s283_s26 = scalar_lea.vmem %s1239_s1, %s939_s23  ;;  %s279_s29 = scalar_lea.vmem %s1238_s0, %s939_s23  ;;  %v1162_v5 = vld [vmem:[%s286_s8] ss:$0 sm:$0xff] }
  0x10   : > { %v297_v1 = vld [vmem:[%s283_s26] sm:$0xf]  ;;  %s1093_s23 = smov 16   ;;  %s941_s25 = sshll.u32 %s1246_s22, 3 }
  0x11   : > { %v304_v2 = vsel %vm299_vm1, %v297_v1, 0  ;;  %v296_v3 = vld [vmem:[%s279_s29] sm:$0xf]  ;;  %v1166_v12 = vcombine.low %v297_v1, %v297_v1  ;;  %s290_s28 = scalar_lea.vmem %s1243_s5, %s941_s25 }
  0x12   : > { %980 = vmatpush3.bf16.xpose.msra.mxu0 %v304_v2  ;;  %v947_v13 = vcombine.low %v296_v3, %v296_v3 }
  0x13   : > { %997 = vmatprep.subr.bf16.mxu0 %v1083_v0  ;;  %369 = vrot.lane.b32.xlu1 %v1166_v12, %s1085_s9  ;;  %s294_s9 = scalar_lea.vmem %s1244_s6, %s941_s25 }
  0x17   : > { %424 = vrot.lane.b32.xlu1 %v1166_v12, %s1086_s10 }
  0x19   : > { %982 = vmatmul.mubr.msk.bf16.vlgmr.msra.gmra.mrb[0].mxu0 %vm299_vm1, %v296_v3 }
  0x1a   : > { %999 = vmatprep.mubr.msk.bf16.mxu0 %vm1084_vm0, %v1083_v0 }
  0x1b   : > { %542 = vrot.lane.b32.xlu1 %v1166_v12, %s1087_s11 }
  0x1f   : > { %540 = vrot.lane.b32.xlu1 %v947_v13, %s1087_s11 }
  0x23   : > { %660 = vrot.lane.b32.xlu1 %v1166_v12, %s1088_s12 }
  0x27   : > { %658 = vrot.lane.b32.xlu1 %v947_v13, %s1088_s12 }
  0x85   : > { %v370_v19 = vpop.permute.xlu1 %369 }
  0x86   : > { %v376_v20 = vsel %vm374_vm2, %v370_v19, 0 }
  0x87   : > { %986 = vmatpush3.bf16.msra.mxu1 %v376_v20 }
  0x88   : > { %991 = vmatprep.subr.bf16.mxu1 %v1083_v0 }
  0x89   : > { %v425_v23 = vpop.permute.xlu1 %424 }
  0x8a   : > { %v430_v25 = vsel %vm299_vm1, %v425_v23, 0 }
  0x8d   : > { %v543_v27 = vpop.permute.xlu1 %542 }
  0x8e   : > { %v548_v30 = vsel %vm299_vm1, %v543_v27, 0 }
  0x91   : > { %v541_v29 = vpop.permute.xlu1 %540 }
  0x95   : > { %v661_v31 = vpop.permute.xlu1 %660 }
  0x96   : > { %v666_v32 = vsel %vm299_vm1, %v661_v31, 0 }
  0x99   : > { %v659_v33 = vpop.permute.xlu1 %658 }
  0xec   : > { %v340_v4 = vpop.f32.mrb[0].mxu0 }
  0xed   : > { %v346_v6 = vmul.f32 0.35355338, %v340_v4  ;;  %v983_v7 = vpop.f32.mrb[1].mxu0 }
  0xee   : > { %v343_v8 = vpop.f32.mrb[2].mxu0 }
  0xef   : > { %v984_v9 = vpop.f32.mrb[3].mxu0  ;;  %v353_v10 = vadd.f32 %v1162_v5, %v346_v6 }
  0xf1   : > { %v354_v11 = vsel %vm299_vm1, %v353_v10, -inf }
  0xf2   : > { %355 = vmax.xlane.f32.xlu0 %v354_v11 }
 0x17f   : > { %v356_v14 = vpop.xlane.xlu0 %355 }
 0x180   : > { %v357_v15 = vsub.f32 %v353_v10, %v356_v14 }
 0x182   : > { %v358_v16 = vmul.f32 1.442695, %v357_v15 }
 0x184   : > { %1059 = vpow2.f32 %v358_v16 }
 0x18e   : > { %v1060_v17 = vpop.eup %1059 }
 0x18f   : > { %v360_v18 = vsel %vm299_vm1, %v1060_v17, 0.0 }
 0x190   : > { %361 = vadd.xlane.f32.xlu0 %v360_v18 }
 0x1a6   : > { %422 = vrot.lane.b32.xlu0 %v947_v13, %s1086_s10 }
 0x21d   : > { %v362_v21 = vpop.xlane.xlu0 %361 }
 0x21e   : > { %1061 = vrcp.f32 %v362_v21 }
 0x221   : > { %v423_v28 = vpop.permute.xlu0 %422 }
 0x228   : > { %v1062_v22 = vpop.eup %1061 }
 0x229   : > { %v364_v24 = vmul.f32 %v1062_v22, %v1060_v17 }
 0x22b   : > { %v365_v26 = vpack.c.bf16 %v364_v24, %v364_v24 }
 0x22d   : > { %988 = vmatmul.mubr.msk.bf16.vlgmr.msra.gmra.mrb[0].mxu1 %vm299_vm1, %v365_v26 }
 0x22e   : > { %992 = vmatpush3.bf16.xpose.msra.mxu1 %v430_v25  ;;  %993 = vmatprep.mubr.msk.bf16.mxu1 %vm1084_vm0, %v1083_v0 }
 0x22f   : > { %1003 = vmatprep.subr.bf16.mxu1 %v1083_v0 }
 0x235   : > { %994 = vmatmul.mubr.msk.bf16.vlgmr.msra.gmra.mrb[4].mxu1 %vm299_vm1, %v423_v28 }
 0x236   : > { %1004 = vmatpush3.bf16.xpose.msra.mxu1 %v548_v30  ;;  %1005 = vmatprep.mubr.msk.bf16.mxu1 %vm1084_vm0, %v1083_v0 }
 0x237   : > { %1015 = vmatprep.subr.bf16.mxu1 %v1083_v0 }
 0x23d   : > { %1006 = vmatmul.mubr.msk.bf16.vlgmr.msra.gmra.mrb[8].mxu1 %vm299_vm1, %v541_v29 }
 0x23e   : > { %1016 = vmatpush3.bf16.xpose.msra.mxu1 %v666_v32  ;;  %1017 = vmatprep.mubr.msk.bf16.mxu1 %vm1084_vm0, %v1083_v0 }
 0x23f   : > { %1027 = vmatprep.subr.bf16.mxu1 %v1083_v0 }
 0x245   : > { %1018 = vmatmul.mubr.msk.bf16.vlgmr.msra.gmra.mrb[12].mxu1 %vm299_vm1, %v659_v33  ;;  %v1057_v33 = vld [vmem:[%s1241_s3] sm:$0xff]  }
 0x246   : > { %1031 = vmatprep.mubr.msk.bf16.mxu1 %vm1084_vm0, %v1083_v0  ;;  %1028 = vmatpush3.bf16.msra.mxu1 %v1057_v33 }
 0x247   : > { %1029 = vmatprep.subr.bf16.mxu1 %v1083_v0 }
 0x300   : > { %v412_v34 = vpop.f32.mrb[0].mxu1 }
 0x301   : > { %418 = vst.msk [vmem:[#allocation2] sm:$0xff] %vm299_vm1, %v412_v34  ;;  %v989_v35 = vpop.f32.mrb[1].mxu1  ;;  %v1058_v34 = vld [vmem:[%s1241_s3 + $0x8] sm:$0xff]  }
 0x302   : > { %v415_v36 = vpop.f32.mrb[2].mxu1  ;;  %1030 = vmatpush3.bf16.msra.mxu1 %v1058_v34 }
 0x303   : > { %v990_v37 = vpop.f32.mrb[3].mxu1 }
 0x308   : > { %v466_v38 = vpop.f32.mrb[4].mxu1 }
 0x309   : > { %v472_v39 = vmul.f32 0.35355338, %v466_v38  ;;  %v995_v40 = vpop.f32.mrb[5].mxu1 }
 0x30a   : > { %v469_v41 = vpop.f32.mrb[6].mxu1 }
 0x30b   : > { %v996_v42 = vpop.f32.mrb[7].mxu1  ;;  %v473_v43 = vadd.f32 %v1162_v5, %v472_v39 }
 0x30d   : > { %v474_v44 = vsel %vm299_vm1, %v473_v43, -inf }
 0x30e   : > { %475 = vmax.xlane.f32.xlu1 %v474_v44 }
 0x310   : > { %v584_v45 = vpop.f32.mrb[8].mxu1 }
 0x311   : > { %v590_v46 = vmul.f32 0.35355338, %v584_v45  ;;  %v1007_v47 = vpop.f32.mrb[9].mxu1 }
 0x312   : > { %v587_v48 = vpop.f32.mrb[10].mxu1  ;;  %v954_v47 = vld [vmem:[%s1242_s4] ss:$0 sm:$0xff] }
 0x313   : > { %v1008_v49 = vpop.f32.mrb[11].mxu1  ;;  %v591_v50 = vadd.f32 %v1162_v5, %v590_v46 }
 0x314   : > { %v845_v49 = vld [vmem:[%s290_s28] sm:$0xff] }
 0x315   : > { %v592_v51 = vsel %vm299_vm1, %v591_v50, -inf }
 0x316   : > { %593 = vmax.xlane.f32.xlu0 %v592_v51 }
 0x318   : > { %v702_v52 = vpop.f32.mrb[12].mxu1 }
 0x319   : > { %v708_v53 = vmul.f32 0.35355338, %v702_v52  ;;  %v1019_v54 = vpop.f32.mrb[13].mxu1 }
 0x31a   : > { %v705_v55 = vpop.f32.mrb[14].mxu1 }
 0x31b   : > { %v1020_v56 = vpop.f32.mrb[15].mxu1  ;;  %v709_v57 = vadd.f32 %v1162_v5, %v708_v53 }
 0x31d   : > { %v710_v58 = vsel %vm299_vm1, %v709_v57, -inf }
 0x31e   : > { %711 = vmax.xlane.f32.xlu1 %v710_v58 }
 0x32f   : > { %486 = vrot.lane.b32.xlu1 %v1166_v12, %s1089_s13 }
 0x39b   : > { %v476_v59 = vpop.xlane.xlu1 %475 }
 0x39c   : > { %v477_v60 = vsub.f32 %v473_v43, %v476_v59 }
 0x39e   : > { %v478_v61 = vmul.f32 1.442695, %v477_v60 }
 0x3a0   : > { %1063 = vpow2.f32 %v478_v61 }
 0x3a3   : > { %v594_v62 = vpop.xlane.xlu0 %593 }
 0x3a4   : > { %v595_v63 = vsub.f32 %v591_v50, %v594_v62 }
 0x3a6   : > { %v596_v1 = vmul.f32 1.442695, %v595_v63 }
 0x3a8   : > { %1065 = vpow2.f32 %v596_v1 }
 0x3aa   : > { %v1064_v2 = vpop.eup %1063 }
 0x3ab   : > { %v712_v3 = vpop.xlane.xlu1 %711  ;;  %v480_v4 = vsel %vm299_vm1, %v1064_v2, 0.0 }
 0x3ac   : > { %v713_v6 = vsub.f32 %v709_v57, %v712_v3  ;;  %481 = vadd.xlane.f32.xlu0 %v480_v4 }
 0x3ae   : > { %v714_v5 = vmul.f32 1.442695, %v713_v6 }
 0x3af   : > { %v487_v7 = vpop.permute.xlu1 %486 }
 0x3b0   : > { %1067 = vpow2.f32 %v714_v5  ;;  %v492_v8 = vsel %vm374_vm2, %v487_v7, 0 }
 0x3b1   : > { %998 = vmatpush3.bf16.msra.mxu0 %v492_v8 }
 0x3b2   : > { %v1066_v9 = vpop.eup %1065  ;;  %1009 = vmatprep.subr.bf16.mxu0 %v1083_v0 }
 0x3b3   : > { %v598_v10 = vsel %vm299_vm1, %v1066_v9, 0.0 }
 0x3b4   : > { %599 = vadd.xlane.f32.xlu1 %v598_v10 }
 0x3ba   : > { %v1068_v11 = vpop.eup %1067 }
 0x3bb   : > { %v716_v13 = vsel %vm299_vm1, %v1068_v11, 0.0 }
 0x3bc   : > { %717 = vadd.xlane.f32.xlu0 %v716_v13 }
 0x3c5   : > { %722 = vrot.lane.b32.xlu1 %v1166_v12, %s1090_s14 }
 0x3d2   : > { %604 = vrot.lane.b32.xlu0 %v1166_v12, %s1091_s15 }
 0x439   : > { %v482_v14 = vpop.xlane.xlu0 %481 }
 0x43a   : > { %1069 = vrcp.f32 %v482_v14 }
 0x441   : > { %v600_v15 = vpop.xlane.xlu1 %599 }
 0x442   : > { %1071 = vrcp.f32 %v600_v15 }
 0x444   : > { %v1070_v16 = vpop.eup %1069 }
 0x445   : > { %v484_v17 = vmul.f32 %v1070_v16, %v1064_v2  ;;  %v723_v23 = vpop.permute.xlu1 %722 }
 0x446   : > { %v728_v25 = vsel %vm374_vm2, %v723_v23, 0 }
 0x447   : > { %v485_v18 = vpack.c.bf16 %v484_v17, %v484_v17 }
 0x449   : > { %v718_v19 = vpop.xlane.xlu0 %717  ;;  %1000 = vmatmul.mubr.msk.bf16.vlgmr.msra.gmra.mrb[4].mxu0 %vm299_vm1, %v485_v18 }
 0x44a   : > { %1073 = vrcp.f32 %v718_v19  ;;  %1011 = vmatprep.mubr.msk.bf16.mxu0 %vm1084_vm0, %v1083_v0 }
 0x44c   : > { %v1072_v20 = vpop.eup %1071 }
 0x44d   : > { %v602_v21 = vmul.f32 %v1072_v20, %v1066_v9  ;;  %v605_v22 = vpop.permute.xlu0 %604 }
 0x44e   : > { %v610_v12 = vsel %vm374_vm2, %v605_v22, 0 }
 0x44f   : > { %1010 = vmatpush3.bf16.msra.mxu0 %v610_v12  ;;  %v603_v24 = vpack.c.bf16 %v602_v21, %v602_v21 }
 0x450   : > { %1021 = vmatprep.subr.bf16.mxu0 %v1083_v0 }
 0x452   : > { %1012 = vmatmul.mubr.msk.bf16.vlgmr.msra.gmra.mrb[8].mxu0 %vm299_vm1, %v603_v24 }
 0x453   : > { %1022 = vmatpush3.bf16.msra.mxu0 %v728_v25  ;;  %1023 = vmatprep.mubr.msk.bf16.mxu0 %vm1084_vm0, %v1083_v0 }
 0x454   : > { %v1074_v26 = vpop.eup %1073 }
 0x455   : > { %v720_v27 = vmul.f32 %v1074_v26, %v1068_v11 }
 0x457   : > { %v721_v28 = vpack.c.bf16 %v720_v27, %v720_v27 }
 0x45a   : > { %1024 = vmatmul.mubr.msk.bf16.vlgmr.msra.gmra.mrb[12].mxu0 %vm299_vm1, %v721_v28 }
 0x51c   : > { %v528_v29 = vpop.f32.mrb[4].mxu0 }
 0x51d   : > { %535 = vrot.lane.b32.xlu1 %v528_v29, %s1092_s16  ;;  %v1001_v30 = vpop.f32.mrb[5].mxu0 }
 0x51e   : > { %v531_v31 = vpop.f32.mrb[6].mxu0 }
 0x51f   : > { %v1002_v32 = vpop.f32.mrb[7].mxu0 }
 0x525   : > { %v646_v35 = vpop.f32.mrb[8].mxu0 }
 0x526   : > { %653 = vrot.lane.b32.xlu0 %v646_v35, %s1093_s23  ;;  %v1013_v36 = vpop.f32.mrb[9].mxu0 }
 0x527   : > { %v649_v37 = vpop.f32.mrb[10].mxu0 }
 0x528   : > { %v1014_v38 = vpop.f32.mrb[11].mxu0 }
 0x52d   : > { %v764_v39 = vpop.f32.mrb[12].mxu0 }
 0x52e   : > { %771 = vrot.lane.b32.xlu1 %v764_v39, %s1094_s24  ;;  %v1025_v40 = vpop.f32.mrb[13].mxu0 }
 0x52f   : > { %v767_v41 = vpop.f32.mrb[14].mxu0 }
 0x530   : > { %v1026_v42 = vpop.f32.mrb[15].mxu0 }
 0x58f   : > { %v536_v43 = vpop.permute.xlu1 %535 }
 0x590   : > { %539 = vst.msk [vmem:[#allocation2] sm:$0xff] %vm538_vm3, %v536_v43 }
 0x598   : > { %v654_v44 = vpop.permute.xlu0 %653 }
 0x599   : > { %657 = vst.msk [vmem:[#allocation2] sm:$0xff] %vm656_vm4, %v654_v44 }
 0x5a0   : > { %v772_v0 = vpop.permute.xlu1 %771 }
 0x5a1   : > { %775 = vst.msk [vmem:[#allocation2] sm:$0xff] %vm774_vm5, %v772_v0 }
 0x5a8   : > { %v776_v45 = vld [vmem:[#allocation2] sm:$0xff] }
 0x5a9   : > { %v777_v46 = vpack.c.bf16 %v776_v45, %v776_v45 }
 0x5ab   : > { %1032 = vmatmul.mubr.msk.bf16.vlgmr.msra.gmra.mrb[16].mxu1 %vm801_vm6, %v777_v46 }
 0x67e   : > { %v839_v48 = vpop.f32.mrb[16].mxu1 }
 0x67f   : > { %v840_v50 = vadd.f32 %v954_v47, %v839_v48  ;;  %v1033_v51 = vpop.f32.mrb[17].mxu1 }
 0x680   : > { %v842_v52 = vpop.f32.mrb[18].mxu1 }
 0x681   : > { %v846_v53 = vadd.f32 %v845_v49, %v840_v50  ;;  %v1034_v54 = vpop.f32.mrb[19].mxu1 }
 0x683   : > { %847 = vst.msk [vmem:[%s294_s9] sm:$0xff] %vm801_vm6, %v846_v53 }
 0x684 PF: > { %s16_s21 = sadd.s32 1, %s1081_s21  }
 0x685   : > { %p13_p4 = scmp.ge.s32.totalorder %s16_s21, 4  }
 0x687   :  { %15 = sbr.rel (!%p13_p4) target bundleno = 1 (0x1), region = 83 }

// kernel: alternating_decoder_forward.21
= control target key start
LH: loop header
LB: loop body
LE: loop exit
PB: predicated region body
PF: predicated region fallthrough
CT: control target
= control target key end

     0   :  { %s640_s24 = smov 0   ;;  %s703_s0 = inlined_call_operand.vmem [shape: f32[16,32], index: 0, kind: input, shape index: {}]   ;;  %s704_s1 = inlined_call_operand.vmem [shape: f32[1,32], index: 1, kind: input, shape index: {}]   ;;  %s705_s2 = inlined_call_operand.vmem [shape: f32[1,32], index: 2, kind: input, shape index: {}]   ;;  %s706_s3 = inlined_call_operand.vmem [shape: bf16[32,64], index: 3, kind: input, shape index: {}]   ;;  %s707_s4 = inlined_call_operand.vmem [shape: f32[1,64], index: 4, kind: input, shape index: {}]   ;;  %s708_s5 = inlined_call_operand.vmem [shape: bf16[64,32], index: 5, kind: input, shape index: {}]   ;;  %s709_s6 = inlined_call_operand.vmem [shape: f32[1,32], index: 6, kind: input, shape index: {}]   ;;  %s710_s7 = inlined_call_operand.vmem [shape: f32[16,32], index: 7, kind: output, shape index: {}]  }
   0x1 LB: > { %s521_s25 = sadd.s32 4294967295, %s596_s24   ;;  %p525_p0 = scmp.ge.s32.totalorder %s596_s24, 1  ;;  %s596_s24 = sphi %s640_s24, %s17_s24  }
   0x2   : > { %p236_p1 = scmp.lt.s32.totalorder %s596_s24, 3 }
   0x4   : > { %p237_p2 = pnand %p525_p0, %p236_p1 }
   0x5   : > { %p266_p3 = scmp.lt.s32.totalorder (!%p237_p2), %s521_s25, 1  ;;  %vm278_vm0 = vcmask (!%p237_p2), 261120   ;;  %v580_v7 = vld [vmem:[%s706_s3] sm:$0xff] (!%p237_p2)   ;;  %v598_v8 = vmov (!%p237_p2), 0.0   ;;  %vm599_vm1 = vmmov (!%p237_p2), 0   ;;  %v581_v9 = vld [vmem:[%s706_s3 + $0x8] sm:$0xff] (!%p237_p2)  }
   0x6   : > { %240 = sbr.rel (%p237_p2) target bundleno = 780 (0x30c), region = 48  ;;  %550 = vmatprep.subr.bf16.mxu0 (!%p237_p2), %v598_v8  ;;  %554 = vmatprep.mubr.msk.bf16.mxu0 (!%p237_p2), %vm599_vm1, %v598_v8  ;;  %v582_v10 = vld [vmem:[%s708_s5] sm:$0xff] (!%p237_p2)   ;;  %v583_v11 = vld [vmem:[%s708_s5 + $0x8] sm:$0xff] (!%p237_p2)   ;;  %v584_v27 = vld [vmem:[%s708_s5 + $0x10] sm:$0xff] (!%p237_p2)   ;;  %vm422_vm4 = vcmask (!%p237_p2), 523264  }
   0x7   : > { %551 = vmatpush3.bf16.msra.mxu0 (!%p237_p2), %v580_v7  ;;  %558 = vmatprep.subr.bf16.mxu1 (!%p237_p2), %v598_v8  ;;  %v528_v20 = vld [vmem:[%s704_s1] ss:$0 sm:$0xff] (!%p237_p2)  ;;  %v585_v28 = vld [vmem:[%s708_s5 + $0x18] sm:$0xff] (!%p237_p2)  }
   0x8   : > { %552 = vmatprep.subr.bf16.mxu0 (!%p237_p2), %v598_v8  ;;  %566 = vmatprep.mubr.msk.bf16.mxu1 (!%p237_p2), %vm599_vm1, %v598_v8  ;;  %v529_v23 = vld [vmem:[%s705_s2] ss:$0 sm:$0xff] (!%p237_p2) }
   0x9   : > { %559 = vmatpush3.bf16.msra.mxu1 (!%p237_p2), %v582_v10  ;;  %v530_v29 = vld [vmem:[%s707_s4] ss:$0 sm:$0xff] (!%p237_p2) }
   0xa   : > { %560 = vmatprep.subr.bf16.mxu1 (!%p237_p2), %v598_v8  ;;  %v534_v37 = vld [vmem:[%s709_s6] ss:$0 sm:$0xff] (!%p237_p2) }
   0xb   : > { %553 = vmatpush3.bf16.msra.mxu0 (!%p237_p2), %v581_v9 }
   0xd   : > { %s712_s25 = smov (!%p266_p3, %s521_s25), 1  ;;  %561 = vmatpush3.bf16.msra.mxu1 %v583_v11 }
   0xe   : > { %s526_s26 = sshll.u32 %s712_s25, 3  ;;  %562 = vmatprep.subr.bf16.mxu1 %v598_v8 }
   0xf   : > { %s269_s29 = scalar_lea.vmem %s703_s0, %s526_s26  ;;  %s273_s9 = scalar_lea.vmem %s710_s7, %s526_s26 }
  0x10   : > { %v656_v0 = vld [vmem:[%s269_s29] sm:$0xff] }
  0x11   : > { %v279_v1 = vsel %vm278_vm0, %v656_v0, 0.0  ;;  %563 = vmatpush3.bf16.msra.mxu1 %v584_v27 }
  0x12   : > { %280 = vadd.xlane.f32.xlu0 %v279_v1  ;;  %564 = vmatprep.subr.bf16.mxu1 %v598_v8 }
  0x15   : > { %565 = vmatpush3.bf16.msra.mxu1 %v585_v28 }
  0x9f   : > { %v281_v2 = vpop.xlane.xlu0 %280 }
  0xa0   : > { %v283_v3 = vmul.f32 0.03125, %v281_v2 }
  0xa2   : > { %v284_v4 = vsub.f32 %v656_v0, %v283_v3 }
  0xa4   : > { %v285_v5 = vmul.f32 %v284_v4, %v284_v4  ;;  %v296_v21 = vmul.f32 %v528_v20, %v284_v4 }
  0xa6   : > { %v286_v6 = vsel %vm278_vm0, %v285_v5, 0.0 }
  0xa7   : > { %287 = vadd.xlane.f32.xlu0 %v286_v6 }
 0x134   : > { %v288_v12 = vpop.xlane.xlu0 %287 }
 0x135   : > { %v289_v13 = vmul.f32 0.032258064, %v288_v12 }
 0x137   : > { %586 = vrsqrt.f32 %v289_v13  ;;  %vm299_vm2 = vcmp.eq.f32.partialorder %v289_v13, inf  ;;  %v302_v16 = vand.u32 2147483648, %v289_v13  ;;  %vm301_vm3 = vcmp.eq.f32.partialorder %v289_v13, 0.0 }
 0x141   : > { %v587_v14 = vpop.eup %586 }
 0x142   : > { %v298_v15 = vmul.f32 %v587_v14, %v289_v13 }
 0x144   : > { %v300_v17 = vsel %vm299_vm2, %v289_v13, %v298_v15 }
 0x145   : > { %v303_v18 = vsel %vm301_vm3, %v302_v16, %v300_v17 }
 0x146   : > { %v304_v19 = vadd.f32 1e-06, %v303_v18 }
 0x148   : > { %588 = vrcp.f32 %v304_v19 }
 0x152   : > { %v589_v22 = vpop.eup %588 }
 0x153   : > { %v306_v24 = vmul.f32 %v589_v22, %v296_v21 }
 0x155   : > { %v313_v25 = vadd.f32 %v529_v23, %v306_v24 }
 0x157   : > { %v314_v26 = vpack.c.bf16 %v313_v25, %v313_v25 }
 0x159   : > { %555 = vmatmul.mubr.msk.bf16.vlgmr.msra.gmra.mrb[0].mxu0 %vm278_vm0, %v314_v26 }
 0x22c   : > { %v375_v30 = vpop.f32.mrb[0].mxu0 }
 0x22d   : > { %v376_v31 = vadd.f32 %v530_v29, %v375_v30  ;;  %v556_v32 = vpop.f32.mrb[1].mxu0 }
 0x22e   : > { %v378_v33 = vpop.f32.mrb[2].mxu0 }
 0x22f   : > { %v381_v34 = vmax.f32 %v376_v31, 0.0  ;;  %v557_v35 = vpop.f32.mrb[3].mxu0 }
 0x231   : > { %v382_v36 = vpack.c.bf16 %v381_v34, %v381_v34 }
 0x233   : > { %567 = vmatmul.mubr.msk.bf16.vlgmr.msra.gmra.mrb[0].mxu1 %vm422_vm4, %v382_v36 }
 0x306   : > { %v460_v38 = vpop.f32.mrb[0].mxu1 }
 0x307   : > { %v461_v39 = vadd.f32 %v534_v37, %v460_v38  ;;  %v568_v40 = vpop.f32.mrb[1].mxu1 }
 0x308   : > { %v463_v41 = vpop.f32.mrb[2].mxu1 }
 0x309   : > { %v466_v42 = vadd.f32 %v461_v39, %v656_v0  ;;  %v569_v43 = vpop.f32.mrb[3].mxu1 }
 0x30b   : > { %467 = vst.msk [vmem:[%s273_s9] sm:$0xff] %vm278_vm0, %v466_v42 }
 0x30c PF: > { %s17_s24 = sadd.s32 1, %s596_s24  }
 0x30d   : > { %p14_p4 = scmp.ge.s32.totalorder %s17_s24, 4  }
 0x30f   :  { %16 = sbr.rel (!%p14_p4) target bundleno = 1 (0x1), region = 78 }

</bundles_post_ra>
